<compile_context>
chip_gen: v6e
topology: v6e:2x2x1
jax: 0.10.0
libtpu: 0.0.40
codegen_flags: <defaults>
</compile_context>

<pallas_src>
import functools

import jax
import jax.numpy as jnp
from jax import lax
from jax.experimental import pallas as pl
from jax.experimental.pallas import tpu as pltpu


# ---------------------------------------------------------------------------
# Small helpers
# ---------------------------------------------------------------------------

def _round_up(x, m):
    return (x + m - 1) // m * m


def _choose_tile(m_rows):
    """Pick a sublane-aligned row tile.

    Large M -> 256/512-row tiles (amortizes per-step overhead); moderate M ->
    two tiles so the 'parallel' grid axis can be megacore-sharded on v7x;
    tiny M -> one 8-row tile.  Returns (tile_rows, padded_M)."""
    if m_rows >= 1024:
        tm = 512
    elif m_rows >= 512:
        tm = 256
    elif m_rows >= 16:
        tm = _round_up((m_rows + 1) // 2, 8)
    else:
        tm = 8
    return tm, _round_up(m_rows, tm)


# ---------------------------------------------------------------------------
# Pallas kernels
# ---------------------------------------------------------------------------

def _conv_relu_pool_kernel(a00_ref, a01_ref, a10_ref, a11_ref, w_ref, b_ref, o_ref):
    """Fused conv (as 4 corner im2col matmuls) + 2x2 max-pool + bias + ReLU.

    max_c(relu(A_c W + b)) == relu(max_c(A_c W) + b) since the bias is shared
    and ReLU is monotone, so bias/ReLU are applied once after the 4-way max.
    Inputs are bf16, accumulation and epilogue math are f32."""
    w = w_ref[...]
    acc = jnp.dot(a00_ref[...], w, preferred_element_type=jnp.float32)
    acc = jnp.maximum(acc, jnp.dot(a01_ref[...], w, preferred_element_type=jnp.float32))
    acc = jnp.maximum(acc, jnp.dot(a10_ref[...], w, preferred_element_type=jnp.float32))
    acc = jnp.maximum(acc, jnp.dot(a11_ref[...], w, preferred_element_type=jnp.float32))
    acc = jnp.maximum(acc + b_ref[...], 0.0)
    o_ref[...] = acc.astype(o_ref.dtype)


def _fc1_fc2_kernel(x_ref, w1_ref, b1_ref, w2_ref, b2_ref, o_ref):
    """Fused fc1 (+bias+ReLU) and fc2 (+bias); both weights stay VMEM-resident."""
    h = jnp.dot(x_ref[...], w1_ref[...], preferred_element_type=jnp.float32)
    h = jnp.maximum(h + b1_ref[...], 0.0)
    o = jnp.dot(h.astype(w2_ref.dtype), w2_ref[...],
                preferred_element_type=jnp.float32)
    o_ref[...] = (o + b2_ref[...]).astype(o_ref.dtype)


# ---------------------------------------------------------------------------
# Stage wrappers (pallas_call plumbing)
# ---------------------------------------------------------------------------

def conv_relu_pool(x, wmat, brow, kh, kw):
    """Fused valid conv (stride 1) + bias + ReLU + 2x2/2 max-pool.

    x: (N, H, W, Cin) NHWC (bf16).  wmat: (kh*kw*Cin, Cout) bf16.
    brow: (1, Cout) f32.  Returns (N, Hp, Wp, Cout) NHWC bf16."""
    N, H, W, C = x.shape
    Ho, Wo = H - kh + 1, W - kw + 1
    Hp, Wp = Ho // 2, Wo // 2
    K, Cout = wmat.shape
    assert K == kh * kw * C

    # im2col per pooling corner: 4 matrices of shape (N*Hp*Wp, K).  Total bytes
    # equal a single full im2col, but the un-pooled conv activation never hits
    # HBM and pooling needs no extra strided copies.
    # TODO(synk): build these patches inside the kernel from a VMEM-resident
    # activation tile to avoid the ~kh*kw x im2col expansion through HBM.
    mats = []
    for dy in range(2):
        for dx in range(2):
            cols = []
            for ki in range(kh):
                for kj in range(kw):
                    cols.append(x[:, dy + ki:dy + ki + 2 * Hp:2,
                                  dx + kj:dx + kj + 2 * Wp:2, :])
            patch = jnp.concatenate(cols, axis=-1)              # (N, Hp, Wp, K)
            mats.append(patch.reshape(N * Hp * Wp, K))

    M = N * Hp * Wp
    tm, Mp = _choose_tile(M)
    mats = [jnp.pad(m, ((0, Mp - M), (0, 0))) for m in mats]

    row_spec = pl.BlockSpec((tm, K), lambda i: (i, 0))
    out = pl.pallas_call(
        _conv_relu_pool_kernel,
        out_shape=jax.ShapeDtypeStruct((Mp, Cout), jnp.bfloat16),
        grid_spec=pltpu.PrefetchScalarGridSpec(
            num_scalar_prefetch=0,
            grid=(Mp // tm,),
            in_specs=[row_spec, row_spec, row_spec, row_spec,
                      pl.BlockSpec((K, Cout), lambda i: (0, 0)),
                      pl.BlockSpec((1, Cout), lambda i: (0, 0))],
            out_specs=pl.BlockSpec((tm, Cout), lambda i: (i, 0)),
        ),
        compiler_params=pltpu.CompilerParams(
            dimension_semantics=("parallel",)),
    )(*mats, wmat, brow)
    return out[:M].reshape(N, Hp, Wp, Cout)


def mlp_head(x, wf1, bf1, wf2, bf2, num_classes):
    """Fused fc1 + ReLU + fc2.  x: (N, 800).  Returns (N, num_classes) f32."""
    M, K = x.shape
    H1 = wf1.shape[1]          # 512 (padded from 500)
    NC = wf2.shape[1]          # 128 (padded from num_classes)
    tm, Mp = _choose_tile(M)
    xp = jnp.pad(x, ((0, Mp - M), (0, 0))).astype(jnp.bfloat16)

    out = pl.pallas_call(
        _fc1_fc2_kernel,
        out_shape=jax.ShapeDtypeStruct((Mp, NC), jnp.float32),
        grid_spec=pltpu.PrefetchScalarGridSpec(
            num_scalar_prefetch=0,
            grid=(Mp // tm,),
            in_specs=[pl.BlockSpec((tm, K), lambda i: (i, 0)),
                      pl.BlockSpec((K, H1), lambda i: (0, 0)),
                      pl.BlockSpec((1, H1), lambda i: (0, 0)),
                      pl.BlockSpec((H1, NC), lambda i: (0, 0)),
                      pl.BlockSpec((1, NC), lambda i: (0, 0))],
            out_specs=pl.BlockSpec((tm, NC), lambda i: (i, 0)),
        ),
        compiler_params=pltpu.CompilerParams(
            dimension_semantics=("parallel",)),
    )(xp, wf1, bf1, wf2, bf2)
    return out[:M, :num_classes]


# ---------------------------------------------------------------------------
# Parameters: PyTorch-layout init + one-time Pallas-friendly preparation
# ---------------------------------------------------------------------------

def init_params(key, num_classes=10):
    """Raw parameters in PyTorch layout (as the nn.Module would hold them)."""
    ks = jax.random.split(key, 8)
    return {
        "w1": jax.random.normal(ks[0], (20, 1, 5, 5), jnp.float32) * 0.1,
        "b1": jax.random.normal(ks[1], (20,), jnp.float32) * 0.1,
        "w2": jax.random.normal(ks[2], (50, 20, 5, 5), jnp.float32) * 0.05,
        "b2": jax.random.normal(ks[3], (50,), jnp.float32) * 0.1,
        "wf1": jax.random.normal(ks[4], (500, 4 * 4 * 50), jnp.float32) * 0.02,
        "bf1": jax.random.normal(ks[5], (500,), jnp.float32) * 0.1,
        "wf2": jax.random.normal(ks[6], (num_classes, 500), jnp.float32) * 0.05,
        "bf2": jax.random.normal(ks[7], (num_classes,), jnp.float32) * 0.1,
    }


def prepare_params(p, num_classes=10):
    """Hoisted one-time weight prep: conv weights flattened to (kh*kw*Cin, Cout)
    bf16 matrices matching NHWC im2col order; fc weights transposed, fc1
    columns permuted from PyTorch's (C,H,W) flatten to our NHWC (H,W,C)
    flatten, and zero-padded to lane-dense widths (500->512, classes->128)."""
    def conv_w(w):
        cout, cin, kh, kw = w.shape
        return w.transpose(2, 3, 1, 0).reshape(kh * kw * cin, cout).astype(jnp.bfloat16)

    c2 = p["w2"].shape[0]                      # 50 channels after conv2
    h1 = p["wf1"].shape[0]                     # 500
    h1_pad = _round_up(h1, 128)                # 512
    nc_pad = _round_up(max(num_classes, 128), 128)  # 128

    # fc1: (500, 800) with columns in (C=50, H=4, W=4) order -> (H, W, C) order,
    # then transpose to (800, 500) and pad to (800, 512).
    wf1 = p["wf1"].reshape(h1, c2, 4, 4).transpose(0, 2, 3, 1).reshape(h1, -1).T
    wf1 = jnp.pad(wf1, ((0, 0), (0, h1_pad - h1)))
    # fc2: (num_classes, 500) -> (500, num_classes) -> pad to (512, 128).
    wf2 = jnp.pad(p["wf2"].T, ((0, h1_pad - h1), (0, nc_pad - num_classes)))

    return {
        "w1": conv_w(p["w1"]),
        "b1": p["b1"].reshape(1, -1).astype(jnp.float32),
        "w2": conv_w(p["w2"]),
        "b2": p["b2"].reshape(1, -1).astype(jnp.float32),
        "wf1": wf1.astype(jnp.bfloat16),
        "bf1": jnp.pad(p["bf1"], (0, h1_pad - h1)).reshape(1, -1).astype(jnp.float32),
        "wf2": wf2.astype(jnp.bfloat16),
        "bf2": jnp.pad(p["bf2"], (0, nc_pad - num_classes)).reshape(1, -1).astype(jnp.float32),
    }


# ---------------------------------------------------------------------------
# LeNet forward (Pallas)
# ---------------------------------------------------------------------------

def lenet_forward(x_nchw, p, num_classes=10):
    # Single entry transpose to NHWC; bf16 for MXU inputs from here on.
    x = x_nchw.transpose(0, 2, 3, 1).astype(jnp.bfloat16)     # (N, 28, 28, 1)
    x = conv_relu_pool(x, p["w1"], p["b1"], 5, 5)             # (N, 12, 12, 20)
    x = conv_relu_pool(x, p["w2"], p["b2"], 5, 5)             # (N, 4, 4, 50)
    x = x.reshape(x.shape[0], -1)                             # (N, 800), HWC order
    return mlp_head(x, p["wf1"], p["bf1"], p["wf2"], p["bf2"], num_classes)


# ---------------------------------------------------------------------------
# Pure-JAX reference (f32, PyTorch layout) for validation
# ---------------------------------------------------------------------------

def lenet_reference(x, p):
    def conv(x, w, b):
        y = lax.conv_general_dilated(
            x, w, window_strides=(1, 1), padding="VALID",
            dimension_numbers=("NCHW", "OIHW", "NCHW"))
        return y + b.reshape(1, -1, 1, 1)

    def pool(x):
        return lax.reduce_window(x, -jnp.inf, lax.max,
                                 (1, 1, 2, 2), (1, 1, 2, 2), "VALID")

    x = jax.nn.relu(conv(x, p["w1"], p["b1"]))
    x = pool(x)
    x = jax.nn.relu(conv(x, p["w2"], p["b2"]))
    x = pool(x)
    x = x.reshape(x.shape[0], -1)
    x = jax.nn.relu(x @ p["wf1"].T + p["bf1"])
    x = x @ p["wf2"].T + p["bf2"]
    return x


if __name__ == "__main__":
    key = jax.random.PRNGKey(0)
    kx, kp = jax.random.split(key)
    # MNIST-shaped input is required by the fixed 4*4*50 flatten: (N, 1, 28, 28)
    x = jax.random.normal(kx, (2, 1, 28, 28), jnp.float32)
    raw_params = init_params(kp, num_classes=10)
    params = prepare_params(raw_params, num_classes=10)

    fwd = jax.jit(functools.partial(lenet_forward, num_classes=10))
    out = fwd(x, params)
    out = jax.block_until_ready(out)

    ref = lenet_reference(x, raw_params)
    assert out.shape == (2, 10), out.shape
    max_err = float(jnp.max(jnp.abs(out - ref)))
    # bf16 MXU inputs with f32 accumulation -> loosened tolerance vs f32 ref.
    assert jnp.allclose(out, ref, atol=5e-2, rtol=5e-2), (
        f"mismatch vs reference (max abs err {max_err})")

    print("KERNEL_OK")
</pallas_src>

<mosaic_0001>
module attributes {stable_mosaic.version = 11 : i64} {
  func.func @_conv_relu_pool_kernel(%arg0: i32, %arg1: memref<144x25xbf16, #tpu.memory_space<vmem>>, %arg2: memref<144x25xbf16, #tpu.memory_space<vmem>>, %arg3: memref<144x25xbf16, #tpu.memory_space<vmem>>, %arg4: memref<144x25xbf16, #tpu.memory_space<vmem>>, %arg5: memref<25x20xbf16, #tpu.memory_space<vmem>>, %arg6: memref<1x20xf32, #tpu.memory_space<vmem>>, %arg7: memref<144x20xbf16, #tpu.memory_space<vmem>>) attributes {dimension_semantics = [#tpu.dimension_semantics<parallel>], iteration_bounds = array<i64: 2>, scalar_prefetch = 0 : i64, scratch_operands = 0 : i64, tpu.core_type = #tpu.core_type<tc>, window_params = [{transform_indices = @transform_0, window_bounds = array<i64: 144, 25>}, {transform_indices = @transform_1, window_bounds = array<i64: 144, 25>}, {transform_indices = @transform_2, window_bounds = array<i64: 144, 25>}, {transform_indices = @transform_3, window_bounds = array<i64: 144, 25>}, {pipeline_mode = #tpu.pipeline_mode<synchronous>, transform_indices = @transform_4, window_bounds = array<i64: 25, 20>}, {pipeline_mode = #tpu.pipeline_mode<synchronous>, transform_indices = @transform_5, window_bounds = array<i64: 1, 20>}, {transform_indices = @transform_6, window_bounds = array<i64: 144, 20>}]} {
    %c0 = arith.constant 0 : index
    %c0_0 = arith.constant 0 : index
    %0 = vector.load %arg5[%c0, %c0_0] : memref<25x20xbf16, #tpu.memory_space<vmem>>, vector<25x20xbf16>
    %c0_1 = arith.constant 0 : index
    %c0_2 = arith.constant 0 : index
    %1 = vector.load %arg1[%c0_1, %c0_2] : memref<144x25xbf16, #tpu.memory_space<vmem>>, vector<144x25xbf16>
    %cst = arith.constant dense<0.000000e+00> : vector<144x20xf32>
    %2 = tpu.matmul %1, %0, %cst {dimension_numbers = #tpu.dot_dimension_numbers<[1], [0], [0], [1], [0, 0, 1, 1], [], []>} : vector<144x25xbf16>, vector<25x20xbf16>, vector<144x20xf32> -> vector<144x20xf32>
    %c0_3 = arith.constant 0 : index
    %c0_4 = arith.constant 0 : index
    %3 = vector.load %arg2[%c0_3, %c0_4] : memref<144x25xbf16, #tpu.memory_space<vmem>>, vector<144x25xbf16>
    %cst_5 = arith.constant dense<0.000000e+00> : vector<144x20xf32>
    %4 = tpu.matmul %3, %0, %cst_5 {dimension_numbers = #tpu.dot_dimension_numbers<[1], [0], [0], [1], [0, 0, 1, 1], [], []>} : vector<144x25xbf16>, vector<25x20xbf16>, vector<144x20xf32> -> vector<144x20xf32>
    %5 = arith.maximumf %2, %4 : vector<144x20xf32>
    %c0_6 = arith.constant 0 : index
    %c0_7 = arith.constant 0 : index
    %6 = vector.load %arg3[%c0_6, %c0_7] : memref<144x25xbf16, #tpu.memory_space<vmem>>, vector<144x25xbf16>
    %cst_8 = arith.constant dense<0.000000e+00> : vector<144x20xf32>
    %7 = tpu.matmul %6, %0, %cst_8 {dimension_numbers = #tpu.dot_dimension_numbers<[1], [0], [0], [1], [0, 0, 1, 1], [], []>} : vector<144x25xbf16>, vector<25x20xbf16>, vector<144x20xf32> -> vector<144x20xf32>
    %8 = arith.maximumf %5, %7 : vector<144x20xf32>
    %c0_9 = arith.constant 0 : index
    %c0_10 = arith.constant 0 : index
    %9 = vector.load %arg4[%c0_9, %c0_10] : memref<144x25xbf16, #tpu.memory_space<vmem>>, vector<144x25xbf16>
    %cst_11 = arith.constant dense<0.000000e+00> : vector<144x20xf32>
    %10 = tpu.matmul %9, %0, %cst_11 {dimension_numbers = #tpu.dot_dimension_numbers<[1], [0], [0], [1], [0, 0, 1, 1], [], []>} : vector<144x25xbf16>, vector<25x20xbf16>, vector<144x20xf32> -> vector<144x20xf32>
    %11 = arith.maximumf %8, %10 : vector<144x20xf32>
    %c0_12 = arith.constant 0 : index
    %c0_13 = arith.constant 0 : index
    %12 = vector.load %arg6[%c0_12, %c0_13] : memref<1x20xf32, #tpu.memory_space<vmem>>, vector<1x20xf32>
    %13 = vector.broadcast %12 : vector<1x20xf32> to vector<144x20xf32>
    %14 = arith.addf %11, %13 : vector<144x20xf32>
    %cst_14 = arith.constant 0.000000e+00 : f32
    %15 = vector.broadcast %cst_14 : f32 to vector<144x20xf32>
    %16 = arith.maximumf %14, %15 : vector<144x20xf32>
    %17 = arith.truncf %16 : vector<144x20xf32> to vector<144x20xbf16>
    %c0_15 = arith.constant 0 : index
    %c0_16 = arith.constant 0 : index
    %18 = vector.load %arg7[%c0_15, %c0_16] : memref<144x20xbf16, #tpu.memory_space<vmem>>, vector<144x20xbf16>
    tpu.vector_store %arg7[%c0_15, %c0_16], %17 {strides = array<i32>} : memref<144x20xbf16, #tpu.memory_space<vmem>>, vector<144x20xbf16>,
    return
  }
  func.func @transform_0(%arg0: i32) -> (i32, i32) {
    %c0_i32 = arith.constant 0 : i32
    %c0_i32_0 = arith.constant 0 : i32
    return %arg0, %c0_i32 : i32, i32
  }
  func.func @transform_1(%arg0: i32) -> (i32, i32) {
    %c0_i32 = arith.constant 0 : i32
    %c0_i32_0 = arith.constant 0 : i32
    return %arg0, %c0_i32 : i32, i32
  }
  func.func @transform_2(%arg0: i32) -> (i32, i32) {
    %c0_i32 = arith.constant 0 : i32
    %c0_i32_0 = arith.constant 0 : i32
    return %arg0, %c0_i32 : i32, i32
  }
  func.func @transform_3(%arg0: i32) -> (i32, i32) {
    %c0_i32 = arith.constant 0 : i32
    %c0_i32_0 = arith.constant 0 : i32
    return %arg0, %c0_i32 : i32, i32
  }
  func.func @transform_4(%arg0: i32) -> (i32, i32) {
    %c0_i32 = arith.constant 0 : i32
    %c0_i32_0 = arith.constant 0 : i32
    %c0_i32_1 = arith.constant 0 : i32
    return %c0_i32, %c0_i32_0 : i32, i32
  }
  func.func @transform_5(%arg0: i32) -> (i32, i32) {
    %c0_i32 = arith.constant 0 : i32
    %c0_i32_0 = arith.constant 0 : i32
    %c0_i32_1 = arith.constant 0 : i32
    return %c0_i32, %c0_i32_0 : i32, i32
  }
  func.func @transform_6(%arg0: i32) -> (i32, i32) {
    %c0_i32 = arith.constant 0 : i32
    %c0_i32_0 = arith.constant 0 : i32
    return %arg0, %c0_i32 : i32, i32
  }
}

module attributes {stable_mosaic.version = 11 : i64} {
  func.func @_conv_relu_pool_kernel(%arg0: i32, %arg1: memref<16x500xbf16, #tpu.memory_space<vmem>>, %arg2: memref<16x500xbf16, #tpu.memory_space<vmem>>, %arg3: memref<16x500xbf16, #tpu.memory_space<vmem>>, %arg4: memref<16x500xbf16, #tpu.memory_space<vmem>>, %arg5: memref<500x50xbf16, #tpu.memory_space<vmem>>, %arg6: memref<1x50xf32, #tpu.memory_space<vmem>>, %arg7: memref<16x50xbf16, #tpu.memory_space<vmem>>) attributes {dimension_semantics = [#tpu.dimension_semantics<parallel>], iteration_bounds = array<i64: 2>, scalar_prefetch = 0 : i64, scratch_operands = 0 : i64, tpu.core_type = #tpu.core_type<tc>, window_params = [{transform_indices = @transform_0, window_bounds = array<i64: 16, 500>}, {transform_indices = @transform_1, window_bounds = array<i64: 16, 500>}, {transform_indices = @transform_2, window_bounds = array<i64: 16, 500>}, {transform_indices = @transform_3, window_bounds = array<i64: 16, 500>}, {pipeline_mode = #tpu.pipeline_mode<synchronous>, transform_indices = @transform_4, window_bounds = array<i64: 500, 50>}, {pipeline_mode = #tpu.pipeline_mode<synchronous>, transform_indices = @transform_5, window_bounds = array<i64: 1, 50>}, {transform_indices = @transform_6, window_bounds = array<i64: 16, 50>}]} {
    %c0 = arith.constant 0 : index
    %c0_0 = arith.constant 0 : index
    %0 = vector.load %arg5[%c0, %c0_0] : memref<500x50xbf16, #tpu.memory_space<vmem>>, vector<500x50xbf16>
    %c0_1 = arith.constant 0 : index
    %c0_2 = arith.constant 0 : index
    %1 = vector.load %arg1[%c0_1, %c0_2] : memref<16x500xbf16, #tpu.memory_space<vmem>>, vector<16x500xbf16>
    %cst = arith.constant dense<0.000000e+00> : vector<16x50xf32>
    %2 = tpu.matmul %1, %0, %cst {dimension_numbers = #tpu.dot_dimension_numbers<[1], [0], [0], [1], [0, 0, 1, 1], [], []>} : vector<16x500xbf16>, vector<500x50xbf16>, vector<16x50xf32> -> vector<16x50xf32>
    %c0_3 = arith.constant 0 : index
    %c0_4 = arith.constant 0 : index
    %3 = vector.load %arg2[%c0_3, %c0_4] : memref<16x500xbf16, #tpu.memory_space<vmem>>, vector<16x500xbf16>
    %cst_5 = arith.constant dense<0.000000e+00> : vector<16x50xf32>
    %4 = tpu.matmul %3, %0, %cst_5 {dimension_numbers = #tpu.dot_dimension_numbers<[1], [0], [0], [1], [0, 0, 1, 1], [], []>} : vector<16x500xbf16>, vector<500x50xbf16>, vector<16x50xf32> -> vector<16x50xf32>
    %5 = arith.maximumf %2, %4 : vector<16x50xf32>
    %c0_6 = arith.constant 0 : index
    %c0_7 = arith.constant 0 : index
    %6 = vector.load %arg3[%c0_6, %c0_7] : memref<16x500xbf16, #tpu.memory_space<vmem>>, vector<16x500xbf16>
    %cst_8 = arith.constant dense<0.000000e+00> : vector<16x50xf32>
    %7 = tpu.matmul %6, %0, %cst_8 {dimension_numbers = #tpu.dot_dimension_numbers<[1], [0], [0], [1], [0, 0, 1, 1], [], []>} : vector<16x500xbf16>, vector<500x50xbf16>, vector<16x50xf32> -> vector<16x50xf32>
    %8 = arith.maximumf %5, %7 : vector<16x50xf32>
    %c0_9 = arith.constant 0 : index
    %c0_10 = arith.constant 0 : index
    %9 = vector.load %arg4[%c0_9, %c0_10] : memref<16x500xbf16, #tpu.memory_space<vmem>>, vector<16x500xbf16>
    %cst_11 = arith.constant dense<0.000000e+00> : vector<16x50xf32>
    %10 = tpu.matmul %9, %0, %cst_11 {dimension_numbers = #tpu.dot_dimension_numbers<[1], [0], [0], [1], [0, 0, 1, 1], [], []>} : vector<16x500xbf16>, vector<500x50xbf16>, vector<16x50xf32> -> vector<16x50xf32>
    %11 = arith.maximumf %8, %10 : vector<16x50xf32>
    %c0_12 = arith.constant 0 : index
    %c0_13 = arith.constant 0 : index
    %12 = vector.load %arg6[%c0_12, %c0_13] : memref<1x50xf32, #tpu.memory_space<vmem>>, vector<1x50xf32>
    %13 = vector.broadcast %12 : vector<1x50xf32> to vector<16x50xf32>
    %14 = arith.addf %11, %13 : vector<16x50xf32>
    %cst_14 = arith.constant 0.000000e+00 : f32
    %15 = vector.broadcast %cst_14 : f32 to vector<16x50xf32>
    %16 = arith.maximumf %14, %15 : vector<16x50xf32>
    %17 = arith.truncf %16 : vector<16x50xf32> to vector<16x50xbf16>
    %c0_15 = arith.constant 0 : index
    %c0_16 = arith.constant 0 : index
    %18 = vector.load %arg7[%c0_15, %c0_16] : memref<16x50xbf16, #tpu.memory_space<vmem>>, vector<16x50xbf16>
    tpu.vector_store %arg7[%c0_15, %c0_16], %17 {strides = array<i32>} : memref<16x50xbf16, #tpu.memory_space<vmem>>, vector<16x50xbf16>,
    return
  }
  func.func @transform_0(%arg0: i32) -> (i32, i32) {
    %c0_i32 = arith.constant 0 : i32
    %c0_i32_0 = arith.constant 0 : i32
    return %arg0, %c0_i32 : i32, i32
  }
  func.func @transform_1(%arg0: i32) -> (i32, i32) {
    %c0_i32 = arith.constant 0 : i32
    %c0_i32_0 = arith.constant 0 : i32
    return %arg0, %c0_i32 : i32, i32
  }
  func.func @transform_2(%arg0: i32) -> (i32, i32) {
    %c0_i32 = arith.constant 0 : i32
    %c0_i32_0 = arith.constant 0 : i32
    return %arg0, %c0_i32 : i32, i32
  }
  func.func @transform_3(%arg0: i32) -> (i32, i32) {
    %c0_i32 = arith.constant 0 : i32
    %c0_i32_0 = arith.constant 0 : i32
    return %arg0, %c0_i32 : i32, i32
  }
  func.func @transform_4(%arg0: i32) -> (i32, i32) {
    %c0_i32 = arith.constant 0 : i32
    %c0_i32_0 = arith.constant 0 : i32
    %c0_i32_1 = arith.constant 0 : i32
    return %c0_i32, %c0_i32_0 : i32, i32
  }
  func.func @transform_5(%arg0: i32) -> (i32, i32) {
    %c0_i32 = arith.constant 0 : i32
    %c0_i32_0 = arith.constant 0 : i32
    %c0_i32_1 = arith.constant 0 : i32
    return %c0_i32, %c0_i32_0 : i32, i32
  }
  func.func @transform_6(%arg0: i32) -> (i32, i32) {
    %c0_i32 = arith.constant 0 : i32
    %c0_i32_0 = arith.constant 0 : i32
    return %arg0, %c0_i32 : i32, i32
  }
}

module attributes {stable_mosaic.version = 11 : i64} {
  func.func @_fc1_fc2_kernel(%arg0: i32, %arg1: memref<8x800xbf16, #tpu.memory_space<vmem>>, %arg2: memref<800x512xbf16, #tpu.memory_space<vmem>>, %arg3: memref<1x512xf32, #tpu.memory_space<vmem>>, %arg4: memref<512x128xbf16, #tpu.memory_space<vmem>>, %arg5: memref<1x128xf32, #tpu.memory_space<vmem>>, %arg6: memref<8x128xf32, #tpu.memory_space<vmem>>) attributes {dimension_semantics = [#tpu.dimension_semantics<parallel>], iteration_bounds = array<i64: 1>, scalar_prefetch = 0 : i64, scratch_operands = 0 : i64, tpu.core_type = #tpu.core_type<tc>, window_params = [{transform_indices = @transform_0, window_bounds = array<i64: 8, 800>}, {pipeline_mode = #tpu.pipeline_mode<synchronous>, transform_indices = @transform_1, window_bounds = array<i64: 800, 512>}, {pipeline_mode = #tpu.pipeline_mode<synchronous>, transform_indices = @transform_2, window_bounds = array<i64: 1, 512>}, {pipeline_mode = #tpu.pipeline_mode<synchronous>, transform_indices = @transform_3, window_bounds = array<i64: 512, 128>}, {pipeline_mode = #tpu.pipeline_mode<synchronous>, transform_indices = @transform_4, window_bounds = array<i64: 1, 128>}, {transform_indices = @transform_5, window_bounds = array<i64: 8, 128>}]} {
    %c0 = arith.constant 0 : index
    %c0_0 = arith.constant 0 : index
    %0 = vector.load %arg1[%c0, %c0_0] : memref<8x800xbf16, #tpu.memory_space<vmem>>, vector<8x800xbf16>
    %c0_1 = arith.constant 0 : index
    %c0_2 = arith.constant 0 : index
    %1 = vector.load %arg2[%c0_1, %c0_2] : memref<800x512xbf16, #tpu.memory_space<vmem>>, vector<800x512xbf16>
    %cst = arith.constant dense<0.000000e+00> : vector<8x512xf32>
    %2 = tpu.matmul %0, %1, %cst {dimension_numbers = #tpu.dot_dimension_numbers<[1], [0], [0], [1], [0, 0, 1, 1], [], []>} : vector<8x800xbf16>, vector<800x512xbf16>, vector<8x512xf32> -> vector<8x512xf32>
    %c0_3 = arith.constant 0 : index
    %c0_4 = arith.constant 0 : index
    %3 = vector.load %arg3[%c0_3, %c0_4] : memref<1x512xf32, #tpu.memory_space<vmem>>, vector<1x512xf32>
    %4 = vector.broadcast %3 : vector<1x512xf32> to vector<8x512xf32>
    %5 = arith.addf %2, %4 : vector<8x512xf32>
    %cst_5 = arith.constant 0.000000e+00 : f32
    %6 = vector.broadcast %cst_5 : f32 to vector<8x512xf32>
    %7 = arith.maximumf %5, %6 : vector<8x512xf32>
    %8 = arith.truncf %7 : vector<8x512xf32> to vector<8x512xbf16>
    %c0_6 = arith.constant 0 : index
    %c0_7 = arith.constant 0 : index
    %9 = vector.load %arg4[%c0_6, %c0_7] : memref<512x128xbf16, #tpu.memory_space<vmem>>, vector<512x128xbf16>
    %cst_8 = arith.constant dense<0.000000e+00> : vector<8x128xf32>
    %10 = tpu.matmul %8, %9, %cst_8 {dimension_numbers = #tpu.dot_dimension_numbers<[1], [0], [0], [1], [0, 0, 1, 1], [], []>} : vector<8x512xbf16>, vector<512x128xbf16>, vector<8x128xf32> -> vector<8x128xf32>
    %c0_9 = arith.constant 0 : index
    %c0_10 = arith.constant 0 : index
    %11 = vector.load %arg5[%c0_9, %c0_10] : memref<1x128xf32, #tpu.memory_space<vmem>>, vector<1x128xf32>
    %12 = vector.broadcast %11 : vector<1x128xf32> to vector<8x128xf32>
    %13 = arith.addf %10, %12 : vector<8x128xf32>
    %c0_11 = arith.constant 0 : index
    %c0_12 = arith.constant 0 : index
    %14 = vector.load %arg6[%c0_11, %c0_12] : memref<8x128xf32, #tpu.memory_space<vmem>>, vector<8x128xf32>
    tpu.vector_store %arg6[%c0_11, %c0_12], %13 {strides = array<i32>} : memref<8x128xf32, #tpu.memory_space<vmem>>, vector<8x128xf32>,
    return
  }
  func.func @transform_0(%arg0: i32) -> (i32, i32) {
    %c0_i32 = arith.constant 0 : i32
    %c0_i32_0 = arith.constant 0 : i32
    return %arg0, %c0_i32 : i32, i32
  }
  func.func @transform_1(%arg0: i32) -> (i32, i32) {
    %c0_i32 = arith.constant 0 : i32
    %c0_i32_0 = arith.constant 0 : i32
    %c0_i32_1 = arith.constant 0 : i32
    return %c0_i32, %c0_i32_0 : i32, i32
  }
  func.func @transform_2(%arg0: i32) -> (i32, i32) {
    %c0_i32 = arith.constant 0 : i32
    %c0_i32_0 = arith.constant 0 : i32
    %c0_i32_1 = arith.constant 0 : i32
    return %c0_i32, %c0_i32_0 : i32, i32
  }
  func.func @transform_3(%arg0: i32) -> (i32, i32) {
    %c0_i32 = arith.constant 0 : i32
    %c0_i32_0 = arith.constant 0 : i32
    %c0_i32_1 = arith.constant 0 : i32
    return %c0_i32, %c0_i32_0 : i32, i32
  }
  func.func @transform_4(%arg0: i32) -> (i32, i32) {
    %c0_i32 = arith.constant 0 : i32
    %c0_i32_0 = arith.constant 0 : i32
    %c0_i32_1 = arith.constant 0 : i32
    return %c0_i32, %c0_i32_0 : i32, i32
  }
  func.func @transform_5(%arg0: i32) -> (i32, i32) {
    %c0_i32 = arith.constant 0 : i32
    %c0_i32_0 = arith.constant 0 : i32
    return %arg0, %c0_i32 : i32, i32
  }
}

</mosaic_0001>

<bundles_post_ra>
// kernel: lenet_forward.3
= control target key start
LH: loop header
LB: loop body
LE: loop exit
PB: predicated region body
PF: predicated region fallthrough
CT: control target
= control target key end

     0   :  { %s1827_s21 = smov 0   ;;  %s2249_s0 = inlined_call_operand.vmem [shape: bf16[288,25], index: 0, kind: input, shape index: {}]   ;;  %s2250_s1 = inlined_call_operand.vmem [shape: bf16[288,25], index: 1, kind: input, shape index: {}]   ;;  %s2251_s2 = inlined_call_operand.vmem [shape: bf16[288,25], index: 2, kind: input, shape index: {}]   ;;  %s2252_s3 = inlined_call_operand.vmem [shape: bf16[288,25], index: 3, kind: input, shape index: {}]   ;;  %s2253_s4 = inlined_call_operand.vmem [shape: bf16[25,20], index: 4, kind: input, shape index: {}]   ;;  %s2254_s5 = inlined_call_operand.vmem [shape: f32[1,20], index: 5, kind: input, shape index: {}]   ;;  %s2255_s6 = inlined_call_operand.vmem [shape: bf16[288,20], index: 6, kind: output, shape index: {}]  }
   0x1 LB: > { %s1405_s22 = sadd.s32 4294967295, %s1787_s21   ;;  %p1409_p0 = scmp.ge.s32.totalorder %s1787_s21, 1  ;;  %s1787_s21 = sphi %s1827_s21, %s16_s21  }
   0x2   : > { %p246_p1 = scmp.lt.s32.totalorder %s1787_s21, 3 }
   0x4   : > { %p247_p2 = pnand %p1409_p0, %p246_p1 }
   0x5   : > { %s291_s25 = smul.u32 (!%p247_p2), 18, %s1405_s22 }
   0x6   : > { %250 = sbr.rel (%p247_p2) target bundleno = 367 (0x16f), region = 44 }
   0x7   : > { %p292_p3 = scmp.lt.s32.totalorder (!%p247_p2), %s291_s25, 35 }
   0xb   : > { %vm428_vm0 = vcmask 1043456   ;;  %v1789_v0 = vmov 0.0   ;;  %v1743_v1 = vld [vmem:[%s2253_s4 + $0x8] sm:$0x1f]   ;;  %vm429_vm1 = vcmask 1044480   ;;  %v1790_v2 = vmov 65535  }
   0xc   : > { %1572 = vmatprep.subr.bf16.mxu0 %v1789_v0  ;;  %1612 = vmatprep.subr.bf16.mxu1 %v1789_v0  ;;  %v430_v3 = vsel %vm428_vm0, 4294967295, %v1790_v2  ;;  %vm1791_vm2 = vmmov 0   ;;  %v1744_v6 = vld [vmem:[%s2253_s4] sm:$0xff]   ;;  %s2260_s25 = smov (!%p292_p3, %s291_s25), 35  ;;  %vm400_vm3 = vcmask 203776   ;;  %vm1294_vm4 = vcmask 158720  }
   0xd   : > { %v431_v4 = vsel %vm429_vm1, %v430_v3, 0  ;;  %1576 = vmatprep.mubr.msk.bf16.mxu0 %vm1791_vm2, %v1789_v0  ;;  %1616 = vmatprep.mubr.msk.bf16.mxu1 %vm1791_vm2, %v1789_v0  ;;  %s1849_s28 = sshll.u32 %s2260_s25, 2 }
   0xe   : > { %v433_v5 = vand.u32 %v1743_v1, %v431_v4  ;;  %s1855_s7 = scalar_lea.vmem %s2249_s0, %s1849_s28  ;;  %s1861_s10 = scalar_lea.vmem %s2250_s1, %s1849_s28 }
   0xf   : > { %v1745_v7 = vld [vmem:[%s1855_s7] sm:$0xff]   ;;  %v1747_v9 = vld [vmem:[%s1855_s7 + $0x8] sm:$0xff]   ;;  %v1749_v11 = vld [vmem:[%s1855_s7 + $0x10] sm:$0xff]   ;;  %s1889_s13 = scalar_lea.vmem %s2251_s2, %s1849_s28  ;;  %s1895_s16 = scalar_lea.vmem %s2252_s3, %s1849_s28 }
  0x10   : > { %1573 = vmatpush3.bf16.msra.mxu0 %v433_v5  ;;  %1613 = vmatpush3.bf16.msra.mxu1 %v433_v5  ;;  %v1746_v8 = vld [vmem:[%s1861_s10] sm:$0xff]   ;;  %v1748_v10 = vld [vmem:[%s1861_s10 + $0x8] sm:$0xff]   ;;  %v1750_v12 = vld [vmem:[%s1861_s10 + $0x10] sm:$0xff]   ;;  %s2143_s22 = scalar_lea.vmem %s2255_s6, %s1849_s28 }
  0x11   : > { %1574 = vmatprep.subr.bf16.mxu0 %v1789_v0  ;;  %1614 = vmatprep.subr.bf16.mxu1 %v1789_v0  ;;  %v1751_v13 = vld [vmem:[%s1855_s7 + $0x18] sm:$0xff]   ;;  %v1753_v15 = vld [vmem:[%s1855_s7 + $0x20] sm:$0xff]   ;;  %v1755_v17 = vld [vmem:[%s1855_s7 + $0x28] sm:$0xff]  }
  0x12   : > { %v1752_v14 = vld [vmem:[%s1861_s10 + $0x18] sm:$0xff]   ;;  %v1754_v16 = vld [vmem:[%s1861_s10 + $0x20] sm:$0xff]   ;;  %v1756_v18 = vld [vmem:[%s1861_s10 + $0x28] sm:$0xff]  }
  0x13   : > { %v1757_v19 = vld [vmem:[%s1855_s7 + $0x30] sm:$0xff]   ;;  %v1759_v21 = vld [vmem:[%s1855_s7 + $0x38] sm:$0xff]   ;;  %v1761_v23 = vld [vmem:[%s1855_s7 + $0x40] sm:$0xff]  }
  0x14   : > { %1575 = vmatpush3.bf16.msra.mxu0 %v1744_v6  ;;  %1615 = vmatpush3.bf16.msra.mxu1 %v1744_v6  ;;  %v1758_v20 = vld [vmem:[%s1861_s10 + $0x30] sm:$0xff]   ;;  %v1760_v22 = vld [vmem:[%s1861_s10 + $0x38] sm:$0xff]   ;;  %v1762_v24 = vld [vmem:[%s1861_s10 + $0x40] sm:$0xff]  }
  0x15   : > { %1652 = vmatprep.subr.bf16.mxu0 %v1789_v0  ;;  %1692 = vmatprep.subr.bf16.mxu1 %v1789_v0  ;;  %v1763_v25 = vld [vmem:[%s1889_s13] sm:$0xff]   ;;  %v1765_v27 = vld [vmem:[%s1889_s13 + $0x8] sm:$0xff]   ;;  %v1767_v29 = vld [vmem:[%s1889_s13 + $0x10] sm:$0xff]  }
  0x16   : > { %v1764_v26 = vld [vmem:[%s1895_s16] sm:$0xff]   ;;  %v1766_v28 = vld [vmem:[%s1895_s16 + $0x8] sm:$0xff]   ;;  %v1768_v30 = vld [vmem:[%s1895_s16 + $0x10] sm:$0xff]  }
  0x17   : > { %1577 = vmatmul.mubr.msk.bf16.vlgmr.msra.gmra.mxu0 %vm400_vm3, %v1745_v7  ;;  %1617 = vmatmul.mubr.msk.bf16.vlgmr.msra.gmra.mxu1 %vm400_vm3, %v1746_v8  ;;  %v1769_v31 = vld [vmem:[%s1889_s13 + $0x18] sm:$0xff]   ;;  %v1771_v33 = vld [vmem:[%s1889_s13 + $0x20] sm:$0xff]   ;;  %v1773_v35 = vld [vmem:[%s1889_s13 + $0x28] sm:$0xff]  }
  0x18   : > { %1653 = vmatpush3.bf16.msra.mxu0 %v433_v5  ;;  %1693 = vmatpush3.bf16.msra.mxu1 %v433_v5  ;;  %v1770_v32 = vld [vmem:[%s1895_s16 + $0x18] sm:$0xff]   ;;  %v1772_v34 = vld [vmem:[%s1895_s16 + $0x20] sm:$0xff]   ;;  %v1774_v36 = vld [vmem:[%s1895_s16 + $0x28] sm:$0xff]  }
  0x19   : > { %1580 = vmatprep.mubr.msk.bf16.mxu0 %vm1791_vm2, %v1789_v0  ;;  %1620 = vmatprep.mubr.msk.bf16.mxu1 %vm1791_vm2, %v1789_v0  ;;  %v1775_v37 = vld [vmem:[%s1889_s13 + $0x30] sm:$0xff]   ;;  %v1777_v39 = vld [vmem:[%s1889_s13 + $0x38] sm:$0xff]   ;;  %v1779_v41 = vld [vmem:[%s1889_s13 + $0x40] sm:$0xff]  }
  0x1a   : > { %1654 = vmatprep.subr.bf16.mxu0 %v1789_v0  ;;  %1694 = vmatprep.subr.bf16.mxu1 %v1789_v0  ;;  %v1776_v38 = vld [vmem:[%s1895_s16 + $0x30] sm:$0xff]   ;;  %v1778_v40 = vld [vmem:[%s1895_s16 + $0x38] sm:$0xff]   ;;  %v1780_v42 = vld [vmem:[%s1895_s16 + $0x40] sm:$0xff]  }
  0x1c   : > { %1655 = vmatpush3.bf16.msra.mxu0 %v1744_v6  ;;  %1695 = vmatpush3.bf16.msra.mxu1 %v1744_v6 }
  0x1f   : > { %1581 = vmatmul.mubr.msk.bf16.gmra.mxu0 %vm400_vm3, %v1747_v9  ;;  %1621 = vmatmul.mubr.msk.bf16.gmra.mxu1 %vm400_vm3, %v1748_v10 }
  0x20   : > { %1584 = vmatprep.mubr.msk.bf16.mxu0 %vm1791_vm2, %v1789_v0  ;;  %1624 = vmatprep.mubr.msk.bf16.mxu1 %vm1791_vm2, %v1789_v0 }
  0x27   : > { %1585 = vmatmul.mubr.msk.bf16.gmra.mxu0 %vm400_vm3, %v1749_v11  ;;  %1625 = vmatmul.mubr.msk.bf16.gmra.mxu1 %vm400_vm3, %v1750_v12 }
  0x28   : > { %1588 = vmatprep.mubr.msk.bf16.mxu0 %vm1791_vm2, %v1789_v0  ;;  %1628 = vmatprep.mubr.msk.bf16.mxu1 %vm1791_vm2, %v1789_v0 }
  0x2f   : > { %1589 = vmatmul.mubr.msk.bf16.gmra.mxu0 %vm400_vm3, %v1751_v13  ;;  %1629 = vmatmul.mubr.msk.bf16.gmra.mxu1 %vm400_vm3, %v1752_v14 }
  0x30   : > { %1592 = vmatprep.mubr.msk.bf16.mxu0 %vm1791_vm2, %v1789_v0  ;;  %1632 = vmatprep.mubr.msk.bf16.mxu1 %vm1791_vm2, %v1789_v0 }
  0x37   : > { %1593 = vmatmul.mubr.msk.bf16.gmra.mxu0 %vm400_vm3, %v1753_v15  ;;  %1633 = vmatmul.mubr.msk.bf16.gmra.mxu1 %vm400_vm3, %v1754_v16 }
  0x38   : > { %1596 = vmatprep.mubr.msk.bf16.mxu0 %vm1791_vm2, %v1789_v0  ;;  %1636 = vmatprep.mubr.msk.bf16.mxu1 %vm1791_vm2, %v1789_v0 }
  0x3f   : > { %1597 = vmatmul.mubr.msk.bf16.gmra.mxu0 %vm400_vm3, %v1755_v17  ;;  %1637 = vmatmul.mubr.msk.bf16.gmra.mxu1 %vm400_vm3, %v1756_v18 }
  0x40   : > { %1600 = vmatprep.mubr.msk.bf16.mxu0 %vm1791_vm2, %v1789_v0  ;;  %1640 = vmatprep.mubr.msk.bf16.mxu1 %vm1791_vm2, %v1789_v0 }
  0x47   : > { %1601 = vmatmul.mubr.msk.bf16.gmra.mxu0 %vm400_vm3, %v1757_v19  ;;  %1641 = vmatmul.mubr.msk.bf16.gmra.mxu1 %vm400_vm3, %v1758_v20 }
  0x48   : > { %1604 = vmatprep.mubr.msk.bf16.mxu0 %vm1791_vm2, %v1789_v0  ;;  %1644 = vmatprep.mubr.msk.bf16.mxu1 %vm1791_vm2, %v1789_v0 }
  0x4f   : > { %1605 = vmatmul.mubr.msk.bf16.gmra.mxu0 %vm400_vm3, %v1759_v21  ;;  %1645 = vmatmul.mubr.msk.bf16.gmra.mxu1 %vm400_vm3, %v1760_v22 }
  0x50   : > { %1608 = vmatprep.mubr.msk.bf16.mxu0 %vm1791_vm2, %v1789_v0  ;;  %1648 = vmatprep.mubr.msk.bf16.mxu1 %vm1791_vm2, %v1789_v0 }
  0x57   : > { %1609 = vmatmul.mubr.msk.bf16.gmra.mxu0 %vm400_vm3, %v1761_v23  ;;  %1649 = vmatmul.mubr.msk.bf16.gmra.mxu1 %vm400_vm3, %v1762_v24 }
  0x58   : > { %1656 = vmatprep.mubr.msk.bf16.mxu0 %vm1791_vm2, %v1789_v0  ;;  %1696 = vmatprep.mubr.msk.bf16.mxu1 %vm1791_vm2, %v1789_v0 }
  0x5f   : > { %1657 = vmatmul.mubr.msk.bf16.vlgmr.msra.gmra.mxu0 %vm400_vm3, %v1763_v25  ;;  %1697 = vmatmul.mubr.msk.bf16.vlgmr.msra.gmra.mxu1 %vm400_vm3, %v1764_v26 }
  0x60   : > { %1660 = vmatprep.mubr.msk.bf16.mxu0 %vm1791_vm2, %v1789_v0  ;;  %1700 = vmatprep.mubr.msk.bf16.mxu1 %vm1791_vm2, %v1789_v0 }
  0x67   : > { %1661 = vmatmul.mubr.msk.bf16.gmra.mxu0 %vm400_vm3, %v1765_v27  ;;  %1701 = vmatmul.mubr.msk.bf16.gmra.mxu1 %vm400_vm3, %v1766_v28 }
  0x68   : > { %1664 = vmatprep.mubr.msk.bf16.mxu0 %vm1791_vm2, %v1789_v0  ;;  %1704 = vmatprep.mubr.msk.bf16.mxu1 %vm1791_vm2, %v1789_v0 }
  0x6f   : > { %1665 = vmatmul.mubr.msk.bf16.gmra.mxu0 %vm400_vm3, %v1767_v29  ;;  %1705 = vmatmul.mubr.msk.bf16.gmra.mxu1 %vm400_vm3, %v1768_v30 }
  0x70   : > { %1668 = vmatprep.mubr.msk.bf16.mxu0 %vm1791_vm2, %v1789_v0  ;;  %1708 = vmatprep.mubr.msk.bf16.mxu1 %vm1791_vm2, %v1789_v0 }
  0x77   : > { %1669 = vmatmul.mubr.msk.bf16.gmra.mxu0 %vm400_vm3, %v1769_v31  ;;  %1709 = vmatmul.mubr.msk.bf16.gmra.mxu1 %vm400_vm3, %v1770_v32 }
  0x78   : > { %1672 = vmatprep.mubr.msk.bf16.mxu0 %vm1791_vm2, %v1789_v0  ;;  %1712 = vmatprep.mubr.msk.bf16.mxu1 %vm1791_vm2, %v1789_v0 }
  0x7f   : > { %1673 = vmatmul.mubr.msk.bf16.gmra.mxu0 %vm400_vm3, %v1771_v33  ;;  %1713 = vmatmul.mubr.msk.bf16.gmra.mxu1 %vm400_vm3, %v1772_v34 }
  0x80   : > { %1676 = vmatprep.mubr.msk.bf16.mxu0 %vm1791_vm2, %v1789_v0  ;;  %1716 = vmatprep.mubr.msk.bf16.mxu1 %vm1791_vm2, %v1789_v0 }
  0x87   : > { %1677 = vmatmul.mubr.msk.bf16.gmra.mxu0 %vm400_vm3, %v1773_v35  ;;  %1717 = vmatmul.mubr.msk.bf16.gmra.mxu1 %vm400_vm3, %v1774_v36 }
  0x88   : > { %1680 = vmatprep.mubr.msk.bf16.mxu0 %vm1791_vm2, %v1789_v0  ;;  %1720 = vmatprep.mubr.msk.bf16.mxu1 %vm1791_vm2, %v1789_v0 }
  0x8f   : > { %1681 = vmatmul.mubr.msk.bf16.gmra.mxu0 %vm400_vm3, %v1775_v37  ;;  %1721 = vmatmul.mubr.msk.bf16.gmra.mxu1 %vm400_vm3, %v1776_v38 }
  0x90   : > { %1684 = vmatprep.mubr.msk.bf16.mxu0 %vm1791_vm2, %v1789_v0  ;;  %1724 = vmatprep.mubr.msk.bf16.mxu1 %vm1791_vm2, %v1789_v0 }
  0x97   : > { %1685 = vmatmul.mubr.msk.bf16.gmra.mxu0 %vm400_vm3, %v1777_v39  ;;  %1725 = vmatmul.mubr.msk.bf16.gmra.mxu1 %vm400_vm3, %v1778_v40 }
  0x98   : > { %1688 = vmatprep.mubr.msk.bf16.mxu0 %vm1791_vm2, %v1789_v0  ;;  %1728 = vmatprep.mubr.msk.bf16.mxu1 %vm1791_vm2, %v1789_v0 }
  0x9f   : > { %1689 = vmatmul.mubr.msk.bf16.gmra.mxu0 %vm400_vm3, %v1779_v41  ;;  %1729 = vmatmul.mubr.msk.bf16.gmra.mxu1 %vm400_vm3, %v1780_v42 }
  0xd7   : > { %v2019_v43 = vpop.f32.mrf.mxu0  ;;  %v2021_v44 = vpop.f32.mrf.mxu1 }
  0xd8   : > { %v735_v45 = vmax.f32 %v2019_v43, %v2021_v44 }
  0xd9   : > { %v1578_v46 = vpop.f32.mrf.mxu0  ;;  %v1618_v47 = vpop.f32.mrf.mxu1 }
  0xdb   : > { %v2025_v48 = vpop.f32.mrf.mxu0  ;;  %v2027_v49 = vpop.f32.mrf.mxu1 }
  0xdc   : > { %v736_v50 = vmax.f32 %v2025_v48, %v2027_v49 }
  0xdd   : > { %v1579_v51 = vpop.f32.mrf.mxu0  ;;  %v1619_v52 = vpop.f32.mrf.mxu1 }
  0xdf   : > { %v2031_v53 = vpop.f32.mrf.mxu0  ;;  %v2033_v54 = vpop.f32.mrf.mxu1 }
  0xe0   : > { %v737_v55 = vmax.f32 %v2031_v53, %v2033_v54 }
  0xe1   : > { %v1582_v56 = vpop.f32.mrf.mxu0  ;;  %v1622_v57 = vpop.f32.mrf.mxu1 }
  0xe3   : > { %v2037_v58 = vpop.f32.mrf.mxu0  ;;  %v2039_v59 = vpop.f32.mrf.mxu1 }
  0xe4   : > { %v738_v60 = vmax.f32 %v2037_v58, %v2039_v59 }
  0xe5   : > { %v1583_v61 = vpop.f32.mrf.mxu0  ;;  %v1623_v62 = vpop.f32.mrf.mxu1 }
  0xe7   : > { %v2043_v63 = vpop.f32.mrf.mxu0  ;;  %v2045_v0 = vpop.f32.mrf.mxu1 }
  0xe8   : > { %v739_v1 = vmax.f32 %v2043_v63, %v2045_v0 }
  0xe9   : > { %v1586_v2 = vpop.f32.mrf.mxu0  ;;  %v1626_v3 = vpop.f32.mrf.mxu1 }
  0xeb   : > { %v2049_v4 = vpop.f32.mrf.mxu0  ;;  %v2051_v5 = vpop.f32.mrf.mxu1 }
  0xec   : > { %v740_v6 = vmax.f32 %v2049_v4, %v2051_v5 }
  0xed   : > { %v1587_v7 = vpop.f32.mrf.mxu0  ;;  %v1627_v8 = vpop.f32.mrf.mxu1 }
  0xef   : > { %v2055_v9 = vpop.f32.mrf.mxu0  ;;  %v2057_v10 = vpop.f32.mrf.mxu1 }
  0xf0   : > { %v741_v11 = vmax.f32 %v2055_v9, %v2057_v10 }
  0xf1   : > { %v1590_v12 = vpop.f32.mrf.mxu0  ;;  %v1630_v13 = vpop.f32.mrf.mxu1 }
  0xf3   : > { %v2061_v14 = vpop.f32.mrf.mxu0  ;;  %v2063_v15 = vpop.f32.mrf.mxu1 }
  0xf4   : > { %v742_v16 = vmax.f32 %v2061_v14, %v2063_v15 }
  0xf5   : > { %v1591_v17 = vpop.f32.mrf.mxu0  ;;  %v1631_v18 = vpop.f32.mrf.mxu1 }
  0xf7   : > { %v2067_v19 = vpop.f32.mrf.mxu0  ;;  %v2069_v20 = vpop.f32.mrf.mxu1 }
  0xf8   : > { %v743_v21 = vmax.f32 %v2067_v19, %v2069_v20 }
  0xf9   : > { %v1594_v22 = vpop.f32.mrf.mxu0  ;;  %v1634_v23 = vpop.f32.mrf.mxu1 }
  0xfb   : > { %v2073_v24 = vpop.f32.mrf.mxu0  ;;  %v2075_v25 = vpop.f32.mrf.mxu1 }
  0xfc   : > { %v744_v26 = vmax.f32 %v2073_v24, %v2075_v25 }
  0xfd   : > { %v1595_v27 = vpop.f32.mrf.mxu0  ;;  %v1635_v28 = vpop.f32.mrf.mxu1 }
  0xff   : > { %v2079_v29 = vpop.f32.mrf.mxu0  ;;  %v2081_v30 = vpop.f32.mrf.mxu1 }
 0x100   : > { %v745_v31 = vmax.f32 %v2079_v29, %v2081_v30 }
 0x101   : > { %v1598_v32 = vpop.f32.mrf.mxu0  ;;  %v1638_v33 = vpop.f32.mrf.mxu1 }
 0x103   : > { %v2085_v34 = vpop.f32.mrf.mxu0  ;;  %v2087_v35 = vpop.f32.mrf.mxu1 }
 0x104   : > { %v746_v36 = vmax.f32 %v2085_v34, %v2087_v35 }
 0x105   : > { %v1599_v37 = vpop.f32.mrf.mxu0  ;;  %v1639_v38 = vpop.f32.mrf.mxu1 }
 0x107   : > { %v2091_v39 = vpop.f32.mrf.mxu0  ;;  %v2093_v40 = vpop.f32.mrf.mxu1 }
 0x108   : > { %v747_v41 = vmax.f32 %v2091_v39, %v2093_v40 }
 0x109   : > { %v1602_v42 = vpop.f32.mrf.mxu0  ;;  %v1642_v46 = vpop.f32.mrf.mxu1 }
 0x10b   : > { %v2097_v47 = vpop.f32.mrf.mxu0  ;;  %v2099_v51 = vpop.f32.mrf.mxu1 }
 0x10c   : > { %v748_v52 = vmax.f32 %v2097_v47, %v2099_v51 }
 0x10d   : > { %v1603_v56 = vpop.f32.mrf.mxu0  ;;  %v1643_v57 = vpop.f32.mrf.mxu1 }
 0x10f   : > { %v2103_v61 = vpop.f32.mrf.mxu0  ;;  %v2105_v62 = vpop.f32.mrf.mxu1 }
 0x110   : > { %v749_v2 = vmax.f32 %v2103_v61, %v2105_v62 }
 0x111   : > { %v1606_v3 = vpop.f32.mrf.mxu0  ;;  %v1646_v7 = vpop.f32.mrf.mxu1 }
 0x112   : > { %v2133_v7 = vld [vmem:[%s2254_s5] ss:$0 sm:$0xff] }
 0x113   : > { %v2109_v8 = vpop.f32.mrf.mxu0  ;;  %v2111_v12 = vpop.f32.mrf.mxu1 }
 0x115   : > { %v1607_v17 = vpop.f32.mrf.mxu0  ;;  %v1647_v18 = vpop.f32.mrf.mxu1 }
 0x117   : > { %v2115_v22 = vpop.f32.mrf.mxu0  ;;  %v2117_v23 = vpop.f32.mrf.mxu1 }
 0x119   : > { %v1610_v28 = vpop.f32.mrf.mxu0  ;;  %v1650_v32 = vpop.f32.mrf.mxu1 }
 0x11b   : > { %v2121_v33 = vpop.f32.mrf.mxu0  ;;  %v2123_v37 = vpop.f32.mrf.mxu1 }
 0x11d   : > { %v1611_v42 = vpop.f32.mrf.mxu0  ;;  %v1651_v46 = vpop.f32.mrf.mxu1 }
 0x11f   : > { %v877_v56 = vpop.f32.mrf.mxu0  ;;  %v1090_v57 = vpop.f32.mrf.mxu1 }
 0x120   : > { %v948_v3 = vmax.f32 %v735_v45, %v877_v56 }
 0x121   : > { %v1658_v17 = vpop.f32.mrf.mxu0  ;;  %v1698_v18 = vpop.f32.mrf.mxu1 }
 0x122   : > { %v1161_v28 = vmax.f32 %v948_v3, %v1090_v57 }
 0x123   : > { %v880_v32 = vpop.f32.mrf.mxu0  ;;  %v1093_v27 = vpop.f32.mrf.mxu1 }
 0x124   : > { %v1186_v42 = vadd.f32 %v2133_v7, %v1161_v28  ;;  %v949_v46 = vmax.f32 %v736_v50, %v880_v32 }
 0x125   : > { %v1659_v38 = vpop.f32.mrf.mxu0  ;;  %v1699_v13 = vpop.f32.mrf.mxu1 }
 0x126   : > { %v1204_v43 = vmax.f32 %v1186_v42, 0.0  ;;  %v1162_v44 = vmax.f32 %v949_v46, %v1093_v27 }
 0x127   : > { %v885_v45 = vpop.f32.mrf.mxu0  ;;  %v1098_v56 = vpop.f32.mrf.mxu1 }
 0x128   : > { %v1510_v57 = vpack.c.bf16 %v1204_v43, %v1204_v43  ;;  %v1187_v3 = vadd.f32 %v2133_v7, %v1162_v44  ;;  %v950_v48 = vmax.f32 %v737_v55, %v885_v45 }
 0x129   : > { %v1662_v49 = vpop.f32.mrf.mxu0  ;;  %v1702_v50 = vpop.f32.mrf.mxu1 }
 0x12a   : > { %1295 = vst.msk [vmem:[%s2143_s22] sm:$0xf] %vm1294_vm4, %v1510_v57  ;;  %v1205_v13 = vmax.f32 %v1187_v3, 0.0  ;;  %v1163_v27 = vmax.f32 %v950_v48, %v1098_v56 }
 0x12b   : > { %v888_v38 = vpop.f32.mrf.mxu0  ;;  %v1101_v17 = vpop.f32.mrf.mxu1 }
 0x12c   : > { %v1511_v18 = vpack.c.bf16 %v1205_v13, %v1205_v13  ;;  %v1188_v28 = vadd.f32 %v2133_v7, %v1163_v27  ;;  %v951_v32 = vmax.f32 %v738_v60, %v888_v38 }
 0x12d   : > { %v1663_v42 = vpop.f32.mrf.mxu0  ;;  %v1703_v46 = vpop.f32.mrf.mxu1 }
 0x12e   : > { %1296 = vst.msk [vmem:[%s2143_s22 + $0x4] sm:$0xf] %vm1294_vm4, %v1511_v18  ;;  %v1206_v53 = vmax.f32 %v1188_v28, 0.0  ;;  %v1164_v54 = vmax.f32 %v951_v32, %v1101_v17 }
 0x12f   : > { %v893_v55 = vpop.f32.mrf.mxu0  ;;  %v1106_v43 = vpop.f32.mrf.mxu1 }
 0x130   : > { %v1512_v44 = vpack.c.bf16 %v1206_v53, %v1206_v53  ;;  %v1189_v45 = vadd.f32 %v2133_v7, %v1164_v54  ;;  %v952_v56 = vmax.f32 %v739_v1, %v893_v55 }
 0x131   : > { %v1666_v57 = vpop.f32.mrf.mxu0  ;;  %v1706_v3 = vpop.f32.mrf.mxu1 }
 0x132   : > { %1297 = vst.msk [vmem:[%s2143_s22 + $0x8] sm:$0xf] %vm1294_vm4, %v1512_v44  ;;  %v1207_v58 = vmax.f32 %v1189_v45, 0.0  ;;  %v1165_v59 = vmax.f32 %v952_v56, %v1106_v43 }
 0x133   : > { %v896_v60 = vpop.f32.mrf.mxu0  ;;  %v1109_v48 = vpop.f32.mrf.mxu1 }
 0x134   : > { %v1513_v49 = vpack.c.bf16 %v1207_v58, %v1207_v58  ;;  %v1190_v50 = vadd.f32 %v2133_v7, %v1165_v59  ;;  %v953_v13 = vmax.f32 %v740_v6, %v896_v60 }
 0x135   : > { %v1667_v27 = vpop.f32.mrf.mxu0  ;;  %v1707_v38 = vpop.f32.mrf.mxu1 }
 0x136   : > { %1298 = vst.msk [vmem:[%s2143_s22 + $0xc] sm:$0xf] %vm1294_vm4, %v1513_v49  ;;  %v1208_v63 = vmax.f32 %v1190_v50, 0.0  ;;  %v1166_v0 = vmax.f32 %v953_v13, %v1109_v48 }
 0x137   : > { %v901_v1 = vpop.f32.mrf.mxu0  ;;  %v1114_v17 = vpop.f32.mrf.mxu1 }
 0x138   : > { %v1514_v18 = vpack.c.bf16 %v1208_v63, %v1208_v63  ;;  %v1191_v28 = vadd.f32 %v2133_v7, %v1166_v0  ;;  %v954_v32 = vmax.f32 %v741_v11, %v901_v1 }
 0x139   : > { %v1670_v42 = vpop.f32.mrf.mxu0  ;;  %v1710_v46 = vpop.f32.mrf.mxu1 }
 0x13a   : > { %1299 = vst.msk [vmem:[%s2143_s22 + $0x10] sm:$0xf] %vm1294_vm4, %v1514_v18  ;;  %v1209_v4 = vmax.f32 %v1191_v28, 0.0  ;;  %v1167_v5 = vmax.f32 %v954_v32, %v1114_v17 }
 0x13b   : > { %v904_v6 = vpop.f32.mrf.mxu0  ;;  %v1117_v53 = vpop.f32.mrf.mxu1 }
 0x13c   : > { %v1515_v54 = vpack.c.bf16 %v1209_v4, %v1209_v4  ;;  %v1192_v55 = vadd.f32 %v2133_v7, %v1167_v5  ;;  %v955_v43 = vmax.f32 %v742_v16, %v904_v6 }
 0x13d   : > { %v1671_v44 = vpop.f32.mrf.mxu0  ;;  %v1711_v45 = vpop.f32.mrf.mxu1 }
 0x13e   : > { %1300 = vst.msk [vmem:[%s2143_s22 + $0x14] sm:$0xf] %vm1294_vm4, %v1515_v54  ;;  %v1210_v9 = vmax.f32 %v1192_v55, 0.0  ;;  %v1168_v10 = vmax.f32 %v955_v43, %v1117_v53 }
 0x13f   : > { %v909_v11 = vpop.f32.mrf.mxu0  ;;  %v1122_v56 = vpop.f32.mrf.mxu1 }
 0x140   : > { %v1516_v57 = vpack.c.bf16 %v1210_v9, %v1210_v9  ;;  %v1193_v3 = vadd.f32 %v2133_v7, %v1168_v10  ;;  %v956_v58 = vmax.f32 %v743_v21, %v909_v11 }
 0x141   : > { %v1674_v59 = vpop.f32.mrf.mxu0  ;;  %v1714_v60 = vpop.f32.mrf.mxu1 }
 0x142   : > { %1301 = vst.msk [vmem:[%s2143_s22 + $0x18] sm:$0xf] %vm1294_vm4, %v1516_v57  ;;  %v1211_v14 = vmax.f32 %v1193_v3, 0.0  ;;  %v1169_v15 = vmax.f32 %v956_v58, %v1122_v56 }
 0x143   : > { %v912_v16 = vpop.f32.mrf.mxu0  ;;  %v1125_v48 = vpop.f32.mrf.mxu1 }
 0x144   : > { %v1517_v49 = vpack.c.bf16 %v1211_v14, %v1211_v14  ;;  %v1194_v50 = vadd.f32 %v2133_v7, %v1169_v15  ;;  %v957_v13 = vmax.f32 %v744_v26, %v912_v16 }
 0x145   : > { %v1675_v27 = vpop.f32.mrf.mxu0  ;;  %v1715_v38 = vpop.f32.mrf.mxu1 }
 0x146   : > { %1302 = vst.msk [vmem:[%s2143_s22 + $0x1c] sm:$0xf] %vm1294_vm4, %v1517_v49  ;;  %v1212_v19 = vmax.f32 %v1194_v50, 0.0  ;;  %v1170_v20 = vmax.f32 %v957_v13, %v1125_v48  ;;  %v2256_v13 = vmax.f32 %v2109_v8, %v2111_v12 }
 0x147   : > { %v917_v21 = vpop.f32.mrf.mxu0  ;;  %v1130_v63 = vpop.f32.mrf.mxu1 }
 0x148   : > { %v1518_v0 = vpack.c.bf16 %v1212_v19, %v1212_v19  ;;  %v1195_v1 = vadd.f32 %v2133_v7, %v1170_v20  ;;  %v958_v17 = vmax.f32 %v745_v31, %v917_v21 }
 0x149   : > { %v1678_v18 = vpop.f32.mrf.mxu0  ;;  %v1718_v28 = vpop.f32.mrf.mxu1 }
 0x14a   : > { %1303 = vst.msk [vmem:[%s2143_s22 + $0x20] sm:$0xf] %vm1294_vm4, %v1518_v0  ;;  %v1213_v24 = vmax.f32 %v1195_v1, 0.0  ;;  %v1171_v25 = vmax.f32 %v958_v17, %v1130_v63  ;;  %v2257_v0 = vmax.f32 %v2115_v22, %v2117_v23 }
 0x14b   : > { %v920_v26 = vpop.f32.mrf.mxu0  ;;  %v1133_v32 = vpop.f32.mrf.mxu1 }
 0x14c   : > { %v1519_v42 = vpack.c.bf16 %v1213_v24, %v1213_v24  ;;  %v1196_v46 = vadd.f32 %v2133_v7, %v1171_v25  ;;  %v959_v4 = vmax.f32 %v746_v36, %v920_v26 }
 0x14d   : > { %v1679_v5 = vpop.f32.mrf.mxu0  ;;  %v1719_v6 = vpop.f32.mrf.mxu1 }
 0x14e   : > { %1304 = vst.msk [vmem:[%s2143_s22 + $0x24] sm:$0xf] %vm1294_vm4, %v1519_v42  ;;  %v1214_v29 = vmax.f32 %v1196_v46, 0.0  ;;  %v1172_v30 = vmax.f32 %v959_v4, %v1133_v32  ;;  %v2258_v32 = vmax.f32 %v2121_v33, %v2123_v37 }
 0x14f   : > { %v925_v31 = vpop.f32.mrf.mxu0  ;;  %v1138_v53 = vpop.f32.mrf.mxu1 }
 0x150   : > { %v1520_v54 = vpack.c.bf16 %v1214_v29, %v1214_v29  ;;  %v1197_v55 = vadd.f32 %v2133_v7, %v1172_v30  ;;  %v960_v43 = vmax.f32 %v747_v41, %v925_v31 }
 0x151   : > { %v1682_v44 = vpop.f32.mrf.mxu0  ;;  %v1722_v45 = vpop.f32.mrf.mxu1 }
 0x152   : > { %1305 = vst.msk [vmem:[%s2143_s22 + $0x28] sm:$0xf] %vm1294_vm4, %v1520_v54  ;;  %v1215_v34 = vmax.f32 %v1197_v55, 0.0  ;;  %v1173_v35 = vmax.f32 %v960_v43, %v1138_v53 }
 0x153   : > { %v928_v36 = vpop.f32.mrf.mxu0  ;;  %v1141_v9 = vpop.f32.mrf.mxu1 }
 0x154   : > { %v1521_v10 = vpack.c.bf16 %v1215_v34, %v1215_v34  ;;  %v1198_v11 = vadd.f32 %v2133_v7, %v1173_v35  ;;  %v961_v56 = vmax.f32 %v748_v52, %v928_v36 }
 0x155   : > { %v1683_v57 = vpop.f32.mrf.mxu0  ;;  %v1723_v3 = vpop.f32.mrf.mxu1 }
 0x156   : > { %1306 = vst.msk [vmem:[%s2143_s22 + $0x2c] sm:$0xf] %vm1294_vm4, %v1521_v10  ;;  %v1216_v39 = vmax.f32 %v1198_v11, 0.0  ;;  %v1174_v40 = vmax.f32 %v961_v56, %v1141_v9 }
 0x157   : > { %v933_v41 = vpop.f32.mrf.mxu0  ;;  %v1146_v58 = vpop.f32.mrf.mxu1 }
 0x158   : > { %v1522_v59 = vpack.c.bf16 %v1216_v39, %v1216_v39  ;;  %v1199_v60 = vadd.f32 %v2133_v7, %v1174_v40  ;;  %v962_v14 = vmax.f32 %v749_v2, %v933_v41 }
 0x159   : > { %v1686_v15 = vpop.f32.mrf.mxu0  ;;  %v1726_v16 = vpop.f32.mrf.mxu1 }
 0x15a   : > { %1307 = vst.msk [vmem:[%s2143_s22 + $0x30] sm:$0xf] %vm1294_vm4, %v1522_v59  ;;  %v1217_v47 = vmax.f32 %v1199_v60, 0.0  ;;  %v1175_v51 = vmax.f32 %v962_v14, %v1146_v58 }
 0x15b   : > { %v936_v52 = vpop.f32.mrf.mxu0  ;;  %v1149_v48 = vpop.f32.mrf.mxu1 }
 0x15c   : > { %v1523_v49 = vpack.c.bf16 %v1217_v47, %v1217_v47  ;;  %v1200_v50 = vadd.f32 %v2133_v7, %v1175_v51  ;;  %v963_v27 = vmax.f32 %v2256_v13, %v936_v52 }
 0x15d   : > { %v1687_v38 = vpop.f32.mrf.mxu0  ;;  %v1727_v19 = vpop.f32.mrf.mxu1 }
 0x15e   : > { %1308 = vst.msk [vmem:[%s2143_s22 + $0x34] sm:$0xf] %vm1294_vm4, %v1523_v49  ;;  %v1218_v61 = vmax.f32 %v1200_v50, 0.0  ;;  %v1176_v62 = vmax.f32 %v963_v27, %v1149_v48 }
 0x15f   : > { %v941_v2 = vpop.f32.mrf.mxu0  ;;  %v1154_v20 = vpop.f32.mrf.mxu1 }
 0x160   : > { %v1524_v21 = vpack.c.bf16 %v1218_v61, %v1218_v61  ;;  %v1201_v63 = vadd.f32 %v2133_v7, %v1176_v62  ;;  %v964_v1 = vmax.f32 %v2257_v0, %v941_v2 }
 0x161   : > { %v1690_v17 = vpop.f32.mrf.mxu0  ;;  %v1730_v18 = vpop.f32.mrf.mxu1 }
 0x162   : > { %1309 = vst.msk [vmem:[%s2143_s22 + $0x38] sm:$0xf] %vm1294_vm4, %v1524_v21  ;;  %v1219_v8 = vmax.f32 %v1201_v63, 0.0  ;;  %v1177_v12 = vmax.f32 %v964_v1, %v1154_v20 }
 0x163   : > { %v944_v28 = vpop.f32.mrf.mxu0  ;;  %v1157_v24 = vpop.f32.mrf.mxu1 }
 0x164   : > { %v1525_v25 = vpack.c.bf16 %v1219_v8, %v1219_v8  ;;  %v1202_v26 = vadd.f32 %v2133_v7, %v1177_v12  ;;  %v965_v42 = vmax.f32 %v2258_v32, %v944_v28 }
 0x165   : > { %v1691_v46 = vpop.f32.mrf.mxu0  ;;  %v1731_v22 = vpop.f32.mrf.mxu1 }
 0x166   : > { %1310 = vst.msk [vmem:[%s2143_s22 + $0x3c] sm:$0xf] %vm1294_vm4, %v1525_v25  ;;  %v1220_v23 = vmax.f32 %v1202_v26, 0.0  ;;  %v1178_v4 = vmax.f32 %v965_v42, %v1157_v24 }
 0x168   : > { %v1526_v5 = vpack.c.bf16 %v1220_v23, %v1220_v23  ;;  %v1203_v6 = vadd.f32 %v2133_v7, %v1178_v4 }
 0x16a   : > { %1311 = vst.msk [vmem:[%s2143_s22 + $0x40] sm:$0xf] %vm1294_vm4, %v1526_v5  ;;  %v1221_v29 = vmax.f32 %v1203_v6, 0.0 }
 0x16c   : > { %v1527_v30 = vpack.c.bf16 %v1221_v29, %v1221_v29 }
 0x16e   : > { %1312 = vst.msk [vmem:[%s2143_s22 + $0x44] sm:$0xf] %vm1294_vm4, %v1527_v30 }
 0x16f PF: > { %s16_s21 = sadd.s32 1, %s1787_s21  }
 0x170   : > { %p13_p4 = scmp.ge.s32.totalorder %s16_s21, 4  }
 0x172   :  { %15 = sbr.rel (!%p13_p4) target bundleno = 1 (0x1), region = 83 }

// kernel: lenet_forward.4
= control target key start
LH: loop header
LB: loop body
LE: loop exit
PB: predicated region body
PF: predicated region fallthrough
CT: control target
= control target key end

     0   :  { %s1512_s21 = smov 0   ;;  %s1867_s0 = inlined_call_operand.vmem [shape: bf16[32,500], index: 0, kind: input, shape index: {}]   ;;  %s1868_s1 = inlined_call_operand.vmem [shape: bf16[32,500], index: 1, kind: input, shape index: {}]   ;;  %s1869_s2 = inlined_call_operand.vmem [shape: bf16[32,500], index: 2, kind: input, shape index: {}]   ;;  %s1870_s3 = inlined_call_operand.vmem [shape: bf16[32,500], index: 3, kind: input, shape index: {}]   ;;  %s1871_s4 = inlined_call_operand.vmem [shape: bf16[500,50], index: 4, kind: input, shape index: {}]   ;;  %s1872_s5 = inlined_call_operand.vmem [shape: f32[1,50], index: 5, kind: input, shape index: {}]   ;;  %s1873_s6 = inlined_call_operand.vmem [shape: bf16[32,50], index: 6, kind: output, shape index: {}]  }
   0x1 LB: > { %s1143_s22 = sadd.s32 4294967295, %s1475_s21   ;;  %p1147_p0 = scmp.ge.s32.totalorder %s1475_s21, 1  ;;  %s1475_s21 = sphi %s1512_s21, %s16_s21  }
   0x2   : > { %p250_p1 = scmp.lt.s32.totalorder %s1475_s21, 3 }
   0x4   : > { %p251_p2 = pnand %p1147_p0, %p250_p1 }
   0x5   : > { %s1148_s9 = sshll.u32 (!%p251_p2), %s1143_s22, 1 }
   0x6   : > { %254 = sbr.rel (%p251_p2) target bundleno = 355 (0x163), region = 44  ;;  %p300_p3 = scmp.lt.s32.totalorder (!%p251_p2), %s1148_s9, 3 }
   0xb   : > { %v1523_v0 = vld [vmem:[%s1871_s4 + $0x78] sm:$0xff]   ;;  %vm613_vm0 = vcmask 1041408   ;;  %v1547_v4 = vld [vmem:[%s1871_s4 + $0x70] sm:$0xff]   ;;  %v1571_v8 = vld [vmem:[%s1871_s4 + $0x68] sm:$0xff]   ;;  %s1875_s9 = smov (!%p300_p3, %s1148_s9), 3  ;;  %vm609_vm1 = vcmask 949248  }
   0xc   : > { %v1528_v1 = vld [vmem:[%s1871_s4 + $0xf8] ss:$0 sps:$4 sm:$0x33]   ;;  %1225 = vmatprep.subr.bf16.mxu0 %v1523_v0  ;;  %v1553_v5 = vld [vmem:[%s1871_s4 + $0xf0] sm:$0xff]   ;;  %v1577_v9 = vld [vmem:[%s1871_s4 + $0xe8] sm:$0xff]   ;;  %s1686_s10 = sshll.u32 %s1875_s9, 4 }
   0xd   : > { %v1533_v2 = vld [vmem:[%s1871_s4 + $0x38] sm:$0xff]   ;;  %1401 = vmatprep.subr.msk.bf16.mxu1 %vm613_vm0, %v1528_v1  ;;  %v1559_v6 = vld [vmem:[%s1871_s4 + $0x30] sm:$0xff]   ;;  %v1583_v10 = vld [vmem:[%s1871_s4 + $0x28] sm:$0xff]   ;;  %s304_s18 = scalar_lea.vmem %s1867_s0, %s1686_s10  ;;  %s1727_s27 = scalar_lea.vmem %s1868_s1, %s1686_s10  ;;  %vm1048_vm2 = vcmask 404480  }
   0xe   : > { %1226 = vmatpush3.bf16.msra.mxu0 %v1533_v2  ;;  %v1542_v3 = vld [vmem:[%s1871_s4 + $0xb8] sm:$0xff]   ;;  %v1565_v7 = vld [vmem:[%s1871_s4 + $0xb0] sm:$0xff]   ;;  %v1589_v11 = vld [vmem:[%s1871_s4 + $0xa8] sm:$0xff]   ;;  %s1741_s30 = scalar_lea.vmem %s1869_s2, %s1686_s10  ;;  %s1749_s11 = scalar_lea.vmem %s1870_s3, %s1686_s10 }
   0xf   : > { %1248 = vmatpush3.bf16.msra.mxu1 %v1542_v3  ;;  %1227 = vmatprep.subr.bf16.mxu0 %v1547_v4  ;;  %v1595_v12 = vld [vmem:[%s1871_s4 + $0x60] sm:$0xff]   ;;  %v1621_v16 = vld [vmem:[%s1871_s4 + $0x58] sm:$0xff]   ;;  %v1645_v20 = vld [vmem:[%s1871_s4 + $0x50] sm:$0xff]   ;;  %s1161_s13 = sshll.u32 %s1875_s9, 2 }
  0x10   : > { %1249 = vmatprep.subr.bf16.mxu1 %v1553_v5  ;;  %v1601_v13 = vld [vmem:[%s1871_s4 + $0xe0] sm:$0xff]   ;;  %v1627_v17 = vld [vmem:[%s1871_s4 + $0xd8] sm:$0xff]   ;;  %v1651_v21 = vld [vmem:[%s1871_s4 + $0xd0] sm:$0xff]   ;;  %s331_s22 = scalar_lea.vmem %s1873_s6, %s1161_s13 }
  0x11   : > { %v1607_v14 = vld [vmem:[%s1871_s4 + $0x20] sm:$0xff]   ;;  %v1633_v18 = vld [vmem:[%s1871_s4 + $0x18] sm:$0xff]   ;;  %v1657_v22 = vld [vmem:[%s1871_s4 + $0x10] sm:$0xff]  }
  0x12   : > { %1228 = vmatpush3.bf16.msra.mxu0 %v1559_v6  ;;  %v1613_v15 = vld [vmem:[%s1871_s4 + $0xa0] sm:$0xff]   ;;  %v1639_v19 = vld [vmem:[%s1871_s4 + $0x98] sm:$0xff]   ;;  %v1665_v23 = vld [vmem:[%s1871_s4 + $0x90] sm:$0xff]  }
  0x13   : > { %1250 = vmatpush3.bf16.msra.mxu1 %v1565_v7  ;;  %1229 = vmatprep.subr.bf16.mxu0 %v1571_v8  ;;  %v1671_v24 = vld [vmem:[%s1871_s4 + $0x48] sm:$0xff]   ;;  %v1698_v28 = vld [vmem:[%s1871_s4 + $0x40] sm:$0xff]  }
  0x14   : > { %1251 = vmatprep.subr.bf16.mxu1 %v1577_v9  ;;  %v1677_v25 = vld [vmem:[%s1871_s4 + $0xc8] sm:$0xff]   ;;  %v1704_v29 = vld [vmem:[%s1871_s4 + $0xc0] sm:$0xff]  }
  0x15   : > { %v1683_v26 = vld [vmem:[%s1871_s4 + $0x8] sm:$0xff]   ;;  %v1714_v30 = vld [vmem:[%s1871_s4] sm:$0xff]  }
  0x16   : > { %1230 = vmatpush3.bf16.msra.mxu0 %v1583_v10  ;;  %v1692_v27 = vld [vmem:[%s1871_s4 + $0x88] sm:$0xff]   ;;  %v1720_v31 = vld [vmem:[%s1871_s4 + $0x80] sm:$0xff]  }
  0x17   : > { %1252 = vmatpush3.bf16.msra.mxu1 %v1589_v11  ;;  %1231 = vmatprep.subr.bf16.mxu0 %v1595_v12  ;;  %v1445_v32 = vld [vmem:[%s304_s18] ss:$16 sps:$4 sm:$0xff]   ;;  %v1447_v33 = vld [vmem:[%s304_s18 + $0x4] ss:$16 sps:$4 sm:$0xff]   ;;  %v1448_v34 = vld [vmem:[%s304_s18 + $0x8] ss:$16 sps:$4 sm:$0xff]  }
  0x18   : > { %1253 = vmatprep.subr.bf16.mxu1 %v1601_v13  ;;  %649 = vmatprep.mubr.bf16.mxu0 %v1447_v33  ;;  %v1450_v35 = vld [vmem:[%s304_s18 + $0xc] ss:$16 sps:$4 sm:$0xff]   ;;  %v1453_v36 = vld [vmem:[%s1727_s27 + $0x4] ss:$16 sps:$4 sm:$0xff]   ;;  %v1451_v38 = vld [vmem:[%s1727_s27] ss:$16 sps:$4 sm:$0xff]  }
  0x19   : > { %1198 = vmatprep.mubr.msk.bf16.mxu1 %vm609_vm1, %v1450_v35  ;;  %v1454_v37 = vld [vmem:[%s1727_s27 + $0xc] ss:$16 sps:$4 sm:$0xff]   ;;  %v1459_v39 = vld [vmem:[%s1741_s30 + $0x4] ss:$16 sps:$4 sm:$0xff]   ;;  %v1456_v40 = vld [vmem:[%s1727_s27 + $0x8] ss:$16 sps:$4 sm:$0xff]  }
  0x1a   : > { %1232 = vmatpush3.bf16.msra.mxu0 %v1607_v14  ;;  %v1460_v41 = vld [vmem:[%s1741_s30 + $0xc] ss:$16 sps:$4 sm:$0xff]   ;;  %v1457_v42 = vld [vmem:[%s1741_s30] ss:$16 sps:$4 sm:$0xff]   ;;  %v1465_v43 = vld [vmem:[%s1749_s11 + $0x4] ss:$16 sps:$4 sm:$0xff]  }
  0x1b   : > { %1254 = vmatpush3.bf16.msra.mxu1 %v1613_v15  ;;  %1233 = vmatprep.subr.bf16.mxu0 %v1621_v16  ;;  %v1462_v44 = vld [vmem:[%s1741_s30 + $0x8] ss:$16 sps:$4 sm:$0xff]   ;;  %v1466_v45 = vld [vmem:[%s1749_s11 + $0xc] ss:$16 sps:$4 sm:$0xff]   ;;  %v1463_v46 = vld [vmem:[%s1749_s11] ss:$16 sps:$4 sm:$0xff]  }
  0x1c   : > { %1255 = vmatprep.subr.bf16.mxu1 %v1627_v17  ;;  %v1468_v47 = vld [vmem:[%s1749_s11 + $0x8] ss:$16 sps:$4 sm:$0xff]  }
  0x1e   : > { %1234 = vmatpush3.bf16.msra.mxu0 %v1633_v18 }
  0x1f   : > { %1256 = vmatpush3.bf16.msra.mxu1 %v1639_v19  ;;  %1235 = vmatprep.subr.bf16.mxu0 %v1645_v20 }
  0x20   : > { %1257 = vmatprep.subr.bf16.mxu1 %v1651_v21 }
  0x22   : > { %1236 = vmatpush3.bf16.msra.mxu0 %v1657_v22 }
  0x23   : > { %1258 = vmatpush3.bf16.msra.mxu1 %v1665_v23  ;;  %1237 = vmatprep.subr.bf16.mxu0 %v1671_v24 }
  0x24   : > { %1259 = vmatprep.subr.bf16.mxu1 %v1677_v25 }
  0x26   : > { %1238 = vmatpush3.bf16.msra.mxu0 %v1683_v26 }
  0x27   : > { %1260 = vmatpush3.bf16.msra.mxu1 %v1692_v27  ;;  %1239 = vmatprep.subr.bf16.mxu0 %v1698_v28 }
  0x28   : > { %1261 = vmatprep.subr.bf16.mxu1 %v1704_v29 }
  0x2a   : > { %1240 = vmatpush3.bf16.msra.mxu0 %v1714_v30 }
  0x2b   : > { %1262 = vmatpush3.bf16.msra.mxu1 %v1720_v31  ;;  %1269 = vmatprep.subr.bf16.mxu0 %v1523_v0 }
  0x2c   : > { %1402 = vmatprep.subr.msk.bf16.mxu1 %vm613_vm0, %v1528_v1 }
  0x2d   : > { %650 = vmatmul.mubr.bf16.vlgmr.msra.gmra.mxu0 %v1445_v32 }
  0x2e   : > { %1270 = vmatpush3.bf16.msra.mxu0 %v1533_v2  ;;  %691 = vmatmul.mubr.bf16.vlgmr.msra.gmra.mxu1 %v1448_v34 }
  0x2f   : > { %1271 = vmatprep.subr.bf16.mxu0 %v1547_v4  ;;  %1292 = vmatpush3.bf16.msra.mxu1 %v1542_v3 }
  0x30   : > { %757 = vmatprep.mubr.bf16.mxu0 %v1453_v36  ;;  %1293 = vmatprep.subr.bf16.mxu1 %v1553_v5 }
  0x31   : > { %1203 = vmatprep.mubr.msk.bf16.mxu1 %vm609_vm1, %v1454_v37 }
  0x32   : > { %1272 = vmatpush3.bf16.msra.mxu0 %v1559_v6 }
  0x33   : > { %1273 = vmatprep.subr.bf16.mxu0 %v1571_v8  ;;  %1294 = vmatpush3.bf16.msra.mxu1 %v1565_v7 }
  0x34   : > { %1295 = vmatprep.subr.bf16.mxu1 %v1577_v9 }
  0x36   : > { %1274 = vmatpush3.bf16.msra.mxu0 %v1583_v10 }
  0x37   : > { %1275 = vmatprep.subr.bf16.mxu0 %v1595_v12  ;;  %1296 = vmatpush3.bf16.msra.mxu1 %v1589_v11 }
  0x38   : > { %1297 = vmatprep.subr.bf16.mxu1 %v1601_v13 }
  0x3a   : > { %1276 = vmatpush3.bf16.msra.mxu0 %v1607_v14 }
  0x3b   : > { %1277 = vmatprep.subr.bf16.mxu0 %v1621_v16  ;;  %1298 = vmatpush3.bf16.msra.mxu1 %v1613_v15 }
  0x3c   : > { %1299 = vmatprep.subr.bf16.mxu1 %v1627_v17 }
  0x3e   : > { %1278 = vmatpush3.bf16.msra.mxu0 %v1633_v18 }
  0x3f   : > { %1279 = vmatprep.subr.bf16.mxu0 %v1645_v20  ;;  %1300 = vmatpush3.bf16.msra.mxu1 %v1639_v19 }
  0x40   : > { %1301 = vmatprep.subr.bf16.mxu1 %v1651_v21 }
  0x42   : > { %1280 = vmatpush3.bf16.msra.mxu0 %v1657_v22 }
  0x43   : > { %1281 = vmatprep.subr.bf16.mxu0 %v1671_v24  ;;  %1302 = vmatpush3.bf16.msra.mxu1 %v1665_v23 }
  0x44   : > { %1303 = vmatprep.subr.bf16.mxu1 %v1677_v25 }
  0x46   : > { %1282 = vmatpush3.bf16.msra.mxu0 %v1683_v26 }
  0x47   : > { %1283 = vmatprep.subr.bf16.mxu0 %v1698_v28  ;;  %1304 = vmatpush3.bf16.msra.mxu1 %v1692_v27 }
  0x48   : > { %1305 = vmatprep.subr.bf16.mxu1 %v1704_v29 }
  0x4a   : > { %1284 = vmatpush3.bf16.msra.mxu0 %v1714_v30 }
  0x4b   : > { %1313 = vmatprep.subr.bf16.mxu0 %v1523_v0  ;;  %1306 = vmatpush3.bf16.msra.mxu1 %v1720_v31 }
  0x4c   : > { %1403 = vmatprep.subr.msk.bf16.mxu1 %vm613_vm0, %v1528_v1 }
  0x4d   : > { %758 = vmatmul.mubr.bf16.vlgmr.msra.gmra.mxu0 %v1451_v38 }
  0x4e   : > { %1314 = vmatpush3.bf16.msra.mxu0 %v1533_v2  ;;  %867 = vmatprep.mubr.bf16.mxu0 %v1459_v39  ;;  %v1214_v39 = vld [vmem:[%s1872_s5] ss:$0 sm:$0xff] }
  0x4f   : > { %799 = vmatmul.mubr.bf16.vlgmr.msra.gmra.mxu1 %v1456_v40  ;;  %1315 = vmatprep.subr.bf16.mxu0 %v1547_v4 }
  0x50   : > { %1336 = vmatpush3.bf16.msra.mxu1 %v1542_v3  ;;  %1208 = vmatprep.mubr.msk.bf16.mxu1 %vm609_vm1, %v1460_v41 }
  0x51   : > { %1337 = vmatprep.subr.bf16.mxu1 %v1553_v5 }
  0x52   : > { %1316 = vmatpush3.bf16.msra.mxu0 %v1559_v6 }
  0x53   : > { %1317 = vmatprep.subr.bf16.mxu0 %v1571_v8 }
  0x54   : > { %1338 = vmatpush3.bf16.msra.mxu1 %v1565_v7 }
  0x55   : > { %1339 = vmatprep.subr.bf16.mxu1 %v1577_v9 }
  0x56   : > { %1318 = vmatpush3.bf16.msra.mxu0 %v1583_v10 }
  0x57   : > { %1319 = vmatprep.subr.bf16.mxu0 %v1595_v12 }
  0x58   : > { %1340 = vmatpush3.bf16.msra.mxu1 %v1589_v11 }
  0x59   : > { %1341 = vmatprep.subr.bf16.mxu1 %v1601_v13 }
  0x5a   : > { %1320 = vmatpush3.bf16.msra.mxu0 %v1607_v14 }
  0x5b   : > { %1321 = vmatprep.subr.bf16.mxu0 %v1621_v16 }
  0x5c   : > { %1342 = vmatpush3.bf16.msra.mxu1 %v1613_v15 }
  0x5d   : > { %1343 = vmatprep.subr.bf16.mxu1 %v1627_v17 }
  0x5e   : > { %1322 = vmatpush3.bf16.msra.mxu0 %v1633_v18 }
  0x5f   : > { %1323 = vmatprep.subr.bf16.mxu0 %v1645_v20 }
  0x60   : > { %1344 = vmatpush3.bf16.msra.mxu1 %v1639_v19 }
  0x61   : > { %1345 = vmatprep.subr.bf16.mxu1 %v1651_v21 }
  0x62   : > { %1324 = vmatpush3.bf16.msra.mxu0 %v1657_v22 }
  0x63   : > { %1325 = vmatprep.subr.bf16.mxu0 %v1671_v24 }
  0x64   : > { %1346 = vmatpush3.bf16.msra.mxu1 %v1665_v23 }
  0x65   : > { %1347 = vmatprep.subr.bf16.mxu1 %v1677_v25 }
  0x66   : > { %1326 = vmatpush3.bf16.msra.mxu0 %v1683_v26 }
  0x67   : > { %1327 = vmatprep.subr.bf16.mxu0 %v1698_v28 }
  0x68   : > { %1348 = vmatpush3.bf16.msra.mxu1 %v1692_v27 }
  0x69   : > { %1349 = vmatprep.subr.bf16.mxu1 %v1704_v29 }
  0x6a   : > { %1328 = vmatpush3.bf16.msra.mxu0 %v1714_v30 }
  0x6b   : > { %1357 = vmatprep.subr.bf16.mxu0 %v1523_v0 }
  0x6c   : > { %1350 = vmatpush3.bf16.msra.mxu1 %v1720_v31 }
  0x6d   : > { %868 = vmatmul.mubr.bf16.vlgmr.msra.gmra.mxu0 %v1457_v42  ;;  %1404 = vmatprep.subr.msk.bf16.mxu1 %vm613_vm0, %v1528_v1 }
  0x6e   : > { %1358 = vmatpush3.bf16.msra.mxu0 %v1533_v2  ;;  %977 = vmatprep.mubr.bf16.mxu0 %v1465_v43 }
  0x6f   : > { %909 = vmatmul.mubr.bf16.vlgmr.msra.gmra.mxu1 %v1462_v44  ;;  %1359 = vmatprep.subr.bf16.mxu0 %v1547_v4 }
  0x70   : > { %1380 = vmatpush3.bf16.msra.mxu1 %v1542_v3  ;;  %1213 = vmatprep.mubr.msk.bf16.mxu1 %vm609_vm1, %v1466_v45 }
  0x71   : > { %1381 = vmatprep.subr.bf16.mxu1 %v1553_v5 }
  0x72   : > { %1360 = vmatpush3.bf16.msra.mxu0 %v1559_v6 }
  0x73   : > { %1361 = vmatprep.subr.bf16.mxu0 %v1571_v8 }
  0x74   : > { %1382 = vmatpush3.bf16.msra.mxu1 %v1565_v7 }
  0x75   : > { %1383 = vmatprep.subr.bf16.mxu1 %v1577_v9 }
  0x76   : > { %1362 = vmatpush3.bf16.msra.mxu0 %v1583_v10 }
  0x77   : > { %1363 = vmatprep.subr.bf16.mxu0 %v1595_v12 }
  0x78   : > { %1384 = vmatpush3.bf16.msra.mxu1 %v1589_v11 }
  0x79   : > { %1385 = vmatprep.subr.bf16.mxu1 %v1601_v13 }
  0x7a   : > { %1364 = vmatpush3.bf16.msra.mxu0 %v1607_v14 }
  0x7b   : > { %1365 = vmatprep.subr.bf16.mxu0 %v1621_v16 }
  0x7c   : > { %1386 = vmatpush3.bf16.msra.mxu1 %v1613_v15 }
  0x7d   : > { %1387 = vmatprep.subr.bf16.mxu1 %v1627_v17 }
  0x7e   : > { %1366 = vmatpush3.bf16.msra.mxu0 %v1633_v18 }
  0x7f   : > { %1367 = vmatprep.subr.bf16.mxu0 %v1645_v20 }
  0x80   : > { %1388 = vmatpush3.bf16.msra.mxu1 %v1639_v19 }
  0x81   : > { %1389 = vmatprep.subr.bf16.mxu1 %v1651_v21 }
  0x82   : > { %1368 = vmatpush3.bf16.msra.mxu0 %v1657_v22 }
  0x83   : > { %1369 = vmatprep.subr.bf16.mxu0 %v1671_v24 }
  0x84   : > { %1390 = vmatpush3.bf16.msra.mxu1 %v1665_v23 }
  0x85   : > { %1391 = vmatprep.subr.bf16.mxu1 %v1677_v25 }
  0x86   : > { %1370 = vmatpush3.bf16.msra.mxu0 %v1683_v26 }
  0x87   : > { %1371 = vmatprep.subr.bf16.mxu0 %v1698_v28 }
  0x88   : > { %1392 = vmatpush3.bf16.msra.mxu1 %v1692_v27 }
  0x89   : > { %1393 = vmatprep.subr.bf16.mxu1 %v1704_v29 }
  0x8a   : > { %1372 = vmatpush3.bf16.msra.mxu0 %v1714_v30 }
  0x8c   : > { %1394 = vmatpush3.bf16.msra.mxu1 %v1720_v31 }
  0x8d   : > { %978 = vmatmul.mubr.bf16.vlgmr.msra.gmra.mxu0 %v1463_v46 }
  0x8f   : > { %1019 = vmatmul.mubr.bf16.vlgmr.msra.gmra.mxu1 %v1468_v47 }
  0xed   : > { %v1241_v48 = vpop.f32.mrf.mxu0 }
  0xee   : > { %v1263_v49 = vpop.f32.mrf.mxu1 }
  0xef   : > { %v1242_v50 = vpop.f32.mrf.mxu0 }
  0xf0   : > { %v1264_v51 = vpop.f32.mrf.mxu1  ;;  %v1243_v8 = vadd.f32 %v1242_v50, %v1241_v48 }
  0xf1   : > { %v1244_v52 = vpop.f32.mrf.mxu0  ;;  %v1265_v9 = vadd.f32 %v1264_v51, %v1263_v49 }
  0xf2   : > { %v1266_v53 = vpop.f32.mrf.mxu1 }
  0xf3   : > { %v1245_v54 = vpop.f32.mrf.mxu0  ;;  %v693_v18 = vadd.f32 %v1265_v9, %v1243_v8 }
  0xf4   : > { %v1267_v55 = vpop.f32.mrf.mxu1  ;;  %v1246_v19 = vadd.f32 %v1245_v54, %v1244_v52 }
  0xf5   : > { %v1268_v20 = vadd.f32 %v1267_v55, %v1266_v53 }
  0xf7   : > { %v696_v32 = vadd.f32 %v1268_v20, %v1246_v19 }
 0x10d   : > { %v1285_v56 = vpop.f32.mrf.mxu0 }
 0x10f   : > { %v1307_v57 = vpop.f32.mrf.mxu1  ;;  %v1286_v58 = vpop.f32.mrf.mxu0 }
 0x110   : > { %v1287_v6 = vadd.f32 %v1286_v58, %v1285_v56 }
 0x111   : > { %v1308_v59 = vpop.f32.mrf.mxu1  ;;  %v1288_v60 = vpop.f32.mrf.mxu0 }
 0x112   : > { %v1309_v7 = vadd.f32 %v1308_v59, %v1307_v57 }
 0x113   : > { %v1310_v61 = vpop.f32.mrf.mxu1  ;;  %v1289_v62 = vpop.f32.mrf.mxu0 }
 0x114   : > { %v801_v15 = vadd.f32 %v1309_v7, %v1287_v6  ;;  %v1290_v16 = vadd.f32 %v1289_v62, %v1288_v60 }
 0x115   : > { %v1311_v63 = vpop.f32.mrf.mxu1 }
 0x116   : > { %v1312_v17 = vadd.f32 %v1311_v63, %v1310_v61  ;;  %v807_v29 = vmax.f32 %v693_v18, %v801_v15 }
 0x118   : > { %v804_v30 = vadd.f32 %v1312_v17, %v1290_v16 }
 0x11a   : > { %v808_v41 = vmax.f32 %v696_v32, %v804_v30 }
 0x12d   : > { %v1329_v0 = vpop.f32.mrf.mxu0 }
 0x12f   : > { %v1351_v1 = vpop.f32.mrf.mxu1  ;;  %v1330_v2 = vpop.f32.mrf.mxu0 }
 0x130   : > { %v1331_v11 = vadd.f32 %v1330_v2, %v1329_v0 }
 0x131   : > { %v1352_v3 = vpop.f32.mrf.mxu1  ;;  %v1332_v4 = vpop.f32.mrf.mxu0 }
 0x132   : > { %v1353_v12 = vadd.f32 %v1352_v3, %v1351_v1 }
 0x133   : > { %v1354_v5 = vpop.f32.mrf.mxu1  ;;  %v1333_v10 = vpop.f32.mrf.mxu0 }
 0x134   : > { %v911_v23 = vadd.f32 %v1353_v12, %v1331_v11  ;;  %v1334_v24 = vadd.f32 %v1333_v10, %v1332_v4 }
 0x135   : > { %v1355_v13 = vpop.f32.mrf.mxu1 }
 0x136   : > { %v1356_v25 = vadd.f32 %v1355_v13, %v1354_v5  ;;  %v917_v35 = vmax.f32 %v807_v29, %v911_v23 }
 0x138   : > { %v914_v36 = vadd.f32 %v1356_v25, %v1334_v24 }
 0x13a   : > { %v918_v44 = vmax.f32 %v808_v41, %v914_v36 }
 0x14d   : > { %v1373_v14 = vpop.f32.mrf.mxu0 }
 0x14f   : > { %v1395_v21 = vpop.f32.mrf.mxu1  ;;  %v1374_v22 = vpop.f32.mrf.mxu0 }
 0x150   : > { %v1375_v26 = vadd.f32 %v1374_v22, %v1373_v14 }
 0x151   : > { %v1396_v27 = vpop.f32.mrf.mxu1  ;;  %v1376_v28 = vpop.f32.mrf.mxu0 }
 0x152   : > { %v1397_v31 = vadd.f32 %v1396_v27, %v1395_v21 }
 0x153   : > { %v1398_v33 = vpop.f32.mrf.mxu1  ;;  %v1377_v34 = vpop.f32.mrf.mxu0 }
 0x154   : > { %v1021_v37 = vadd.f32 %v1397_v31, %v1375_v26  ;;  %v1378_v38 = vadd.f32 %v1377_v34, %v1376_v28 }
 0x155   : > { %v1399_v40 = vpop.f32.mrf.mxu1 }
 0x156   : > { %v1027_v42 = vmax.f32 %v917_v35, %v1021_v37  ;;  %v1400_v43 = vadd.f32 %v1399_v40, %v1398_v33 }
 0x158   : > { %v1036_v45 = vadd.f32 %v1214_v39, %v1027_v42  ;;  %v1024_v46 = vadd.f32 %v1400_v43, %v1378_v38 }
 0x15a   : > { %v1038_v47 = vmax.f32 %v1036_v45, 0.0  ;;  %v1028_v48 = vmax.f32 %v918_v44, %v1024_v46 }
 0x15c   : > { %v1223_v49 = vpack.c.bf16 %v1038_v47, %v1038_v47  ;;  %v1037_v50 = vadd.f32 %v1214_v39, %v1028_v48 }
 0x15e   : > { %1049 = vst.msk [vmem:[%s331_s22] sm:$0xf] %vm1048_vm2, %v1223_v49  ;;  %v1039_v51 = vmax.f32 %v1037_v50, 0.0 }
 0x160   : > { %v1224_v52 = vpack.c.bf16 %v1039_v51, %v1039_v51 }
 0x162   : > { %1050 = vst.msk [vmem:[%s331_s22 + $0x4] sm:$0xf] %vm1048_vm2, %v1224_v52 }
 0x163 PF: > { %s16_s21 = sadd.s32 1, %s1475_s21  }
 0x164   : > { %p13_p4 = scmp.ge.s32.totalorder %s16_s21, 4  }
 0x166   :  { %15 = sbr.rel (!%p13_p4) target bundleno = 1 (0x1), region = 83 }

// kernel: lenet_forward.5
= control target key start
LH: loop header
LB: loop body
LE: loop exit
PB: predicated region body
PF: predicated region fallthrough
CT: control target
= control target key end

     0   :  { %vm1271_vm0 = vcmask 261120   ;;  %s3371_s1 = inlined_call_operand.vmem [shape: bf16[800,512], index: 1, kind: input, shape index: {}]   ;;  %s3372_s0 = inlined_call_operand.vmem [shape: bf16[8,800], index: 0, kind: input, shape index: {}]   ;;  %s3373_s3 = inlined_call_operand.vmem [shape: bf16[512,128], index: 3, kind: input, shape index: {}]   ;;  %s3374_s2 = inlined_call_operand.vmem [shape: f32[1,512], index: 2, kind: input, shape index: {}]   ;;  %s3375_s4 = inlined_call_operand.vmem [shape: f32[1,128], index: 4, kind: input, shape index: {}]   ;;  %s3376_s5 = inlined_call_operand.vmem [shape: f32[8,128], index: 5, kind: output, shape index: {}]  }
   0x1   :  { %v2246_v0 = vld [vmem:[%s3371_s1 + $0xe4] ss:$16 sps:$4 sm:$0xff]   ;;  %v2250_v2 = vld [vmem:[%s3371_s1 + $0xe0] ss:$16 sps:$4 sm:$0xff]   ;;  %v22_v50 = vld [vmem:[%s3372_s0 + $0x8] sm:$0xff] }
   0x2   :  { %v2248_v1 = vld [vmem:[%s3371_s1 + $0x2e4] ss:$16 sps:$4 sm:$0xff]   ;;  %1275 = vmatprep.subr.bf16.mxu0 %v2246_v0  ;;  %v2251_v3 = vld [vmem:[%s3371_s1 + $0x2e0] ss:$16 sps:$4 sm:$0xff]   ;;  %v2771_v52 = vcombine.high %v22_v50, %v22_v50 }
   0x3   :  { %1316 = vmatprep.subr.bf16.mxu1 %v2248_v1  ;;  %v2252_v4 = vld [vmem:[%s3371_s1 + $0xc4] ss:$16 sps:$4 sm:$0xff]   ;;  %1276 = vmatpush1.bf16.msra.mxu0 %v2250_v2  ;;  %v2256_v6 = vld [vmem:[%s3371_s1 + $0xc0] ss:$16 sps:$4 sm:$0xff]  }
   0x4   :  { %1317 = vmatpush1.bf16.msra.mxu1 %v2251_v3  ;;  %v2254_v5 = vld [vmem:[%s3371_s1 + $0x2c4] ss:$16 sps:$4 sm:$0xff]   ;;  %1277 = vmatprep.subr.bf16.mxu0 %v2252_v4  ;;  %v2257_v7 = vld [vmem:[%s3371_s1 + $0x2c0] ss:$16 sps:$4 sm:$0xff]  }
   0x5   :  { %1318 = vmatprep.subr.bf16.mxu1 %v2254_v5  ;;  %v2258_v8 = vld [vmem:[%s3371_s1 + $0xa4] ss:$16 sps:$4 sm:$0xff]   ;;  %v2262_v10 = vld [vmem:[%s3371_s1 + $0xa0] ss:$16 sps:$4 sm:$0xff]   ;;  %1348 = vmatprep.mubr.bf16.mxu1 %v2771_v52 }
   0x6   :  { %v2260_v9 = vld [vmem:[%s3371_s1 + $0x2a4] ss:$16 sps:$4 sm:$0xff]   ;;  %v2263_v11 = vld [vmem:[%s3371_s1 + $0x2a0] ss:$16 sps:$4 sm:$0xff]  }
   0x7   :  { %1278 = vmatpush1.bf16.msra.mxu0 %v2256_v6  ;;  %v2264_v12 = vld [vmem:[%s3371_s1 + $0x84] ss:$16 sps:$4 sm:$0xff]   ;;  %v2268_v14 = vld [vmem:[%s3371_s1 + $0x80] ss:$16 sps:$4 sm:$0xff]  }
   0x8   :  { %1319 = vmatpush1.bf16.msra.mxu1 %v2257_v7  ;;  %1279 = vmatprep.subr.bf16.mxu0 %v2258_v8  ;;  %v2266_v13 = vld [vmem:[%s3371_s1 + $0x284] ss:$16 sps:$4 sm:$0xff]   ;;  %v2269_v15 = vld [vmem:[%s3371_s1 + $0x280] ss:$16 sps:$4 sm:$0xff]   ;;  %v2828_v7 = vcombine.low %v22_v50, %v22_v50 }
   0x9   :  { %1320 = vmatprep.subr.bf16.mxu1 %v2260_v9  ;;  %v2270_v16 = vld [vmem:[%s3371_s1 + $0x64] ss:$16 sps:$4 sm:$0xff]   ;;  %v2274_v18 = vld [vmem:[%s3371_s1 + $0x60] ss:$16 sps:$4 sm:$0xff]  }
   0xa   :  { %v2272_v17 = vld [vmem:[%s3371_s1 + $0x264] ss:$16 sps:$4 sm:$0xff]   ;;  %v2275_v19 = vld [vmem:[%s3371_s1 + $0x260] ss:$16 sps:$4 sm:$0xff]  }
   0xb   :  { %1280 = vmatpush1.bf16.msra.mxu0 %v2262_v10  ;;  %v2276_v20 = vld [vmem:[%s3371_s1 + $0x44] ss:$16 sps:$4 sm:$0xff]   ;;  %v2280_v22 = vld [vmem:[%s3371_s1 + $0x40] ss:$16 sps:$4 sm:$0xff]  }
   0xc   :  { %1321 = vmatpush1.bf16.msra.mxu1 %v2263_v11  ;;  %1281 = vmatprep.subr.bf16.mxu0 %v2264_v12  ;;  %v2278_v21 = vld [vmem:[%s3371_s1 + $0x244] ss:$16 sps:$4 sm:$0xff]   ;;  %v2281_v23 = vld [vmem:[%s3371_s1 + $0x240] ss:$16 sps:$4 sm:$0xff]  }
   0xd   :  { %1322 = vmatprep.subr.bf16.mxu1 %v2266_v13  ;;  %v2282_v24 = vld [vmem:[%s3371_s1 + $0x24] ss:$16 sps:$4 sm:$0xff]   ;;  %v2286_v26 = vld [vmem:[%s3371_s1 + $0x20] ss:$16 sps:$4 sm:$0xff]  }
   0xe   :  { %v2284_v25 = vld [vmem:[%s3371_s1 + $0x224] ss:$16 sps:$4 sm:$0xff]   ;;  %v2287_v27 = vld [vmem:[%s3371_s1 + $0x220] ss:$16 sps:$4 sm:$0xff]  }
   0xf   :  { %1282 = vmatpush1.bf16.msra.mxu0 %v2268_v14  ;;  %v2288_v28 = vld [vmem:[%s3371_s1 + $0x4] ss:$16 sps:$4 sm:$0xff]   ;;  %v2292_v30 = vld [vmem:[%s3371_s1] ss:$16 sps:$4 sm:$0xff]  }
  0x10   :  { %1323 = vmatpush1.bf16.msra.mxu1 %v2269_v15  ;;  %1283 = vmatprep.subr.bf16.mxu0 %v2270_v16  ;;  %v2290_v29 = vld [vmem:[%s3371_s1 + $0x204] ss:$16 sps:$4 sm:$0xff]   ;;  %v2293_v31 = vld [vmem:[%s3371_s1 + $0x200] ss:$16 sps:$4 sm:$0xff]   ;;  %v2364_v15 = vld [vmem:[%s3371_s1 + $0xec] ss:$16 sps:$4 sm:$0xff]  }
  0x11   :  { %1324 = vmatprep.subr.bf16.mxu1 %v2272_v17  ;;  %v2294_v32 = vld [vmem:[%s3371_s1 + $0x1e4] ss:$16 sps:$4 sm:$0xff]   ;;  %v2298_v34 = vld [vmem:[%s3371_s1 + $0x1e0] ss:$16 sps:$4 sm:$0xff]   ;;  %v2859_v16 = vld [vmem:[%s3372_s0 + $0x18] ss:$0 sps:$4 sm:$0xff]  }
  0x12   :  { %v2296_v33 = vld [vmem:[%s3371_s1 + $0x3e4] ss:$16 sps:$4 sm:$0xff]   ;;  %v2299_v35 = vld [vmem:[%s3371_s1 + $0x3e0] ss:$16 sps:$4 sm:$0xff]   ;;  %v2585_v17 = vmov 0  }
  0x13   :  { %1284 = vmatpush1.bf16.msra.mxu0 %v2274_v18  ;;  %v2300_v36 = vld [vmem:[%s3371_s1 + $0x1c4] ss:$16 sps:$4 sm:$0xff]   ;;  %v2304_v38 = vld [vmem:[%s3371_s1 + $0x1c0] ss:$16 sps:$4 sm:$0xff]  }
  0x14   :  { %1325 = vmatpush1.bf16.msra.mxu1 %v2275_v19  ;;  %1285 = vmatprep.subr.bf16.mxu0 %v2276_v20  ;;  %v2302_v37 = vld [vmem:[%s3371_s1 + $0x3c4] ss:$16 sps:$4 sm:$0xff]   ;;  %v2305_v39 = vld [vmem:[%s3371_s1 + $0x3c0] ss:$16 sps:$4 sm:$0xff]   ;;  %v2362_v19 = vld [vmem:[%s3371_s1 + $0xe8] ss:$16 sps:$4 sm:$0xff]  }
  0x15   :  { %1326 = vmatprep.subr.bf16.mxu1 %v2278_v21  ;;  %v2306_v40 = vld [vmem:[%s3371_s1 + $0x1a4] ss:$16 sps:$4 sm:$0xff]   ;;  %v2310_v42 = vld [vmem:[%s3371_s1 + $0x1a0] ss:$16 sps:$4 sm:$0xff]   ;;  %v2370_v21 = vld [vmem:[%s3371_s1 + $0xcc] ss:$16 sps:$4 sm:$0xff]  }
  0x16   :  { %v2308_v41 = vld [vmem:[%s3371_s1 + $0x3a4] ss:$16 sps:$4 sm:$0xff]   ;;  %v2311_v43 = vld [vmem:[%s3371_s1 + $0x3a0] ss:$16 sps:$4 sm:$0xff]  }
  0x17   :  { %1286 = vmatpush1.bf16.msra.mxu0 %v2280_v22  ;;  %v2312_v44 = vld [vmem:[%s3371_s1 + $0x184] ss:$16 sps:$4 sm:$0xff]   ;;  %v2316_v46 = vld [vmem:[%s3371_s1 + $0x180] ss:$16 sps:$4 sm:$0xff]  }
  0x18   :  { %1327 = vmatpush1.bf16.msra.mxu1 %v2281_v23  ;;  %1287 = vmatprep.subr.bf16.mxu0 %v2282_v24  ;;  %v2314_v45 = vld [vmem:[%s3371_s1 + $0x384] ss:$16 sps:$4 sm:$0xff]   ;;  %v2317_v48 = vld [vmem:[%s3371_s1 + $0x380] ss:$16 sps:$4 sm:$0xff]   ;;  %v2368_v23 = vld [vmem:[%s3371_s1 + $0xc8] ss:$16 sps:$4 sm:$0xff]  }
  0x19   :  { %1328 = vmatprep.subr.bf16.mxu1 %v2284_v25  ;;  %v21_v47 = vld [vmem:[%s3372_s0] sm:$0xff]  ;;  %v2376_v25 = vld [vmem:[%s3371_s1 + $0xac] ss:$16 sps:$4 sm:$0xff]  }
  0x1a   :  { %v2763_v49 = vcombine.high %v21_v47, %v21_v47  ;;  %v2318_v51 = vld [vmem:[%s3371_s1 + $0x164] ss:$16 sps:$4 sm:$0xff]   ;;  %v2322_v54 = vld [vmem:[%s3371_s1 + $0x160] ss:$16 sps:$4 sm:$0xff]   ;;  %v2826_v6 = vcombine.low %v21_v47, %v21_v47  ;;  %v2406_v47 = vld [vmem:[%s3371_s1 + $0xc] ss:$16 sps:$4 sm:$0xff]  }
  0x1b   :  { %1288 = vmatpush1.bf16.msra.mxu0 %v2286_v26  ;;  %v2320_v53 = vld [vmem:[%s3371_s1 + $0x364] ss:$16 sps:$4 sm:$0xff]   ;;  %v2323_v55 = vld [vmem:[%s3371_s1 + $0x360] ss:$16 sps:$4 sm:$0xff]  }
  0x1c   :  { %1329 = vmatpush1.bf16.msra.mxu1 %v2287_v27  ;;  %1289 = vmatprep.subr.bf16.mxu0 %v2288_v28  ;;  %v2324_v56 = vld [vmem:[%s3371_s1 + $0x144] ss:$16 sps:$4 sm:$0xff]   ;;  %v2328_v58 = vld [vmem:[%s3371_s1 + $0x140] ss:$16 sps:$4 sm:$0xff]   ;;  %v2374_v27 = vld [vmem:[%s3371_s1 + $0xa8] ss:$16 sps:$4 sm:$0xff]  }
  0x1d   :  { %1330 = vmatprep.subr.bf16.mxu1 %v2290_v29  ;;  %1307 = vmatprep.mubr.bf16.mxu0 %v2763_v49  ;;  %v2326_v57 = vld [vmem:[%s3371_s1 + $0x344] ss:$16 sps:$4 sm:$0xff]   ;;  %v2329_v59 = vld [vmem:[%s3371_s1 + $0x340] ss:$16 sps:$4 sm:$0xff]   ;;  %v2382_v29 = vld [vmem:[%s3371_s1 + $0x8c] ss:$16 sps:$4 sm:$0xff]  }
  0x1e   :  { %v2330_v60 = vld [vmem:[%s3371_s1 + $0x124] ss:$16 sps:$4 sm:$0xff]   ;;  %v2334_v62 = vld [vmem:[%s3371_s1 + $0x120] ss:$16 sps:$4 sm:$0xff]  }
  0x1f   :  { %1290 = vmatpush1.bf16.msra.mxu0 %v2292_v30  ;;  %v2332_v61 = vld [vmem:[%s3371_s1 + $0x324] ss:$16 sps:$4 sm:$0xff]   ;;  %v2335_v63 = vld [vmem:[%s3371_s1 + $0x320] ss:$16 sps:$4 sm:$0xff]  }
  0x20   :  { %1331 = vmatpush1.bf16.msra.mxu1 %v2293_v31  ;;  %1291 = vmatprep.subr.bf16.mxu0 %v2294_v32  ;;  %v2336_v0 = vld [vmem:[%s3371_s1 + $0x104] ss:$16 sps:$4 sm:$0xff]   ;;  %v2340_v2 = vld [vmem:[%s3371_s1 + $0x100] ss:$16 sps:$4 sm:$0xff]   ;;  %v2380_v31 = vld [vmem:[%s3371_s1 + $0x88] ss:$16 sps:$4 sm:$0xff]  }
  0x21   :  { %1332 = vmatprep.subr.bf16.mxu1 %v2296_v33  ;;  %v2338_v1 = vld [vmem:[%s3371_s1 + $0x304] ss:$16 sps:$4 sm:$0xff]   ;;  %v2341_v3 = vld [vmem:[%s3371_s1 + $0x300] ss:$16 sps:$4 sm:$0xff]   ;;  %v2388_v33 = vld [vmem:[%s3371_s1 + $0x6c] ss:$16 sps:$4 sm:$0xff]  }
  0x22   :  { %v2349_v4 = vld [vmem:[%s3371_s1 + $0x4e4] ss:$16 sps:$4 sm:$0xff]   ;;  %v2347_v8 = vld [vmem:[%s3371_s1 + $0x4e0] ss:$16 sps:$4 sm:$0xff]  }
  0x23   :  { %1292 = vmatpush2.bf16.msra.mxu0 %v2298_v34  ;;  %v2352_v5 = vld [vmem:[%s3371_s1 + $0x624] ss:$16 sps:$4 sm:$0xff]   ;;  %v2350_v9 = vld [vmem:[%s3371_s1 + $0x620] ss:$16 sps:$4 sm:$0xff]  }
  0x24   :  { %1333 = vmatpush2.bf16.msra.mxu1 %v2299_v35  ;;  %1293 = vmatprep.subr.bf16.mxu0 %v2300_v36  ;;  %v2355_v10 = vld [vmem:[%s3371_s1 + $0x4c4] ss:$16 sps:$4 sm:$0xff]   ;;  %v2353_v12 = vld [vmem:[%s3371_s1 + $0x4c0] ss:$16 sps:$4 sm:$0xff]  }
  0x25   :  { %1334 = vmatprep.subr.bf16.mxu1 %v2302_v37  ;;  %v2358_v11 = vld [vmem:[%s3371_s1 + $0x604] ss:$16 sps:$4 sm:$0xff]   ;;  %v2356_v13 = vld [vmem:[%s3371_s1 + $0x600] ss:$16 sps:$4 sm:$0xff]   ;;  %v2386_v37 = vld [vmem:[%s3371_s1 + $0x68] ss:$16 sps:$4 sm:$0xff]  }
  0x26   :  { %v2361_v14 = vld [vmem:[%s3371_s1 + $0x4a4] ss:$16 sps:$4 sm:$0xff]   ;;  %v2359_v18 = vld [vmem:[%s3371_s1 + $0x4a0] ss:$16 sps:$4 sm:$0xff]  }
  0x27   :  { %1294 = vmatpush2.bf16.msra.mxu0 %v2304_v38  ;;  %v2367_v20 = vld [vmem:[%s3371_s1 + $0x484] ss:$16 sps:$4 sm:$0xff]   ;;  %v2365_v22 = vld [vmem:[%s3371_s1 + $0x480] ss:$16 sps:$4 sm:$0xff]  }
  0x28   :  { %1335 = vmatpush2.bf16.msra.mxu1 %v2305_v39  ;;  %1295 = vmatprep.subr.bf16.mxu0 %v2306_v40  ;;  %v2373_v24 = vld [vmem:[%s3371_s1 + $0x464] ss:$16 sps:$4 sm:$0xff]   ;;  %v2371_v26 = vld [vmem:[%s3371_s1 + $0x460] ss:$16 sps:$4 sm:$0xff]   ;;  %v2394_v39 = vld [vmem:[%s3371_s1 + $0x4c] ss:$16 sps:$4 sm:$0xff]  }
  0x29   :  { %1336 = vmatprep.subr.bf16.mxu1 %v2308_v41  ;;  %v2379_v28 = vld [vmem:[%s3371_s1 + $0x444] ss:$16 sps:$4 sm:$0xff]   ;;  %v2377_v30 = vld [vmem:[%s3371_s1 + $0x440] ss:$16 sps:$4 sm:$0xff]   ;;  %v2392_v41 = vld [vmem:[%s3371_s1 + $0x48] ss:$16 sps:$4 sm:$0xff]  }
  0x2a   :  { %v2385_v32 = vld [vmem:[%s3371_s1 + $0x424] ss:$16 sps:$4 sm:$0xff]   ;;  %v2383_v35 = vld [vmem:[%s3371_s1 + $0x420] ss:$16 sps:$4 sm:$0xff]  }
  0x2b   :  { %1296 = vmatpush2.bf16.msra.mxu0 %v2310_v42  ;;  %v2916_v34 = vld [vmem:[%s3372_s0 + $0x10] sm:$0xff] }
  0x2c   :  { %1337 = vmatpush2.bf16.msra.mxu1 %v2311_v43  ;;  %1297 = vmatprep.subr.bf16.mxu0 %v2312_v44  ;;  %v2923_v36 = vcombine.high %v2916_v34, %v2916_v34  ;;  %v2391_v38 = vld [vmem:[%s3371_s1 + $0x404] ss:$16 sps:$4 sm:$0xff]   ;;  %v2389_v40 = vld [vmem:[%s3371_s1 + $0x400] ss:$16 sps:$4 sm:$0xff]   ;;  %v2400_v43 = vld [vmem:[%s3371_s1 + $0x2c] ss:$16 sps:$4 sm:$0xff]  }
  0x2d   :  { %1338 = vmatprep.subr.bf16.mxu1 %v2314_v45  ;;  %v2397_v42 = vld [vmem:[%s3371_s1 + $0x5e4] ss:$16 sps:$4 sm:$0xff]   ;;  %v2395_v44 = vld [vmem:[%s3371_s1 + $0x5e0] ss:$16 sps:$4 sm:$0xff]   ;;  %v2398_v45 = vld [vmem:[%s3371_s1 + $0x28] ss:$16 sps:$4 sm:$0xff]  }
  0x2e   :  { %v2409_v50 = vld [vmem:[%s3371_s1 + $0x5a4] ss:$16 sps:$4 sm:$0xff]  }
  0x2f   :  { %1298 = vmatpush2.bf16.msra.mxu0 %v2316_v46  ;;  %v2403_v46 = vld [vmem:[%s3371_s1 + $0x5c4] ss:$16 sps:$4 sm:$0xff]  }
  0x30   :  { %1339 = vmatpush2.bf16.msra.mxu1 %v2317_v48  ;;  %1299 = vmatprep.subr.bf16.mxu0 %v2318_v51  ;;  %v2401_v48 = vld [vmem:[%s3371_s1 + $0x5c0] ss:$16 sps:$4 sm:$0xff]   ;;  %v2412_v51 = vld [vmem:[%s3371_s1 + $0x1ec] ss:$16 sps:$4 sm:$0xff]  }
  0x31   :  { %1340 = vmatprep.subr.bf16.mxu1 %v2320_v53  ;;  %v2407_v53 = vld [vmem:[%s3371_s1 + $0x5a0] ss:$16 sps:$4 sm:$0xff]  }
  0x33   :  { %1300 = vmatpush2.bf16.msra.mxu0 %v2322_v54  ;;  %v2410_v54 = vld [vmem:[%s3371_s1 + $0x1e8] ss:$16 sps:$4 sm:$0xff]  }
  0x34   :  { %1341 = vmatpush2.bf16.msra.mxu1 %v2323_v55  ;;  %1301 = vmatprep.subr.bf16.mxu0 %v2324_v56  ;;  %v2415_v55 = vld [vmem:[%s3371_s1 + $0x584] ss:$16 sps:$4 sm:$0xff]   ;;  %v2418_v56 = vld [vmem:[%s3371_s1 + $0x1cc] ss:$16 sps:$4 sm:$0xff]  }
  0x35   :  { %1342 = vmatprep.subr.bf16.mxu1 %v2326_v57  ;;  %v2413_v57 = vld [vmem:[%s3371_s1 + $0x580] ss:$16 sps:$4 sm:$0xff]  }
  0x37   :  { %1302 = vmatpush2.bf16.msra.mxu0 %v2328_v58  ;;  %v2416_v58 = vld [vmem:[%s3371_s1 + $0x1c8] ss:$16 sps:$4 sm:$0xff]  }
  0x38   :  { %1343 = vmatpush2.bf16.msra.mxu1 %v2329_v59  ;;  %1303 = vmatprep.subr.bf16.mxu0 %v2330_v60  ;;  %v2421_v59 = vld [vmem:[%s3371_s1 + $0x564] ss:$16 sps:$4 sm:$0xff]   ;;  %v2424_v60 = vld [vmem:[%s3371_s1 + $0x1ac] ss:$16 sps:$4 sm:$0xff]  }
  0x39   :  { %1344 = vmatprep.subr.bf16.mxu1 %v2332_v61  ;;  %v2419_v61 = vld [vmem:[%s3371_s1 + $0x560] ss:$16 sps:$4 sm:$0xff]  }
  0x3b   :  { %1304 = vmatpush2.bf16.msra.mxu0 %v2334_v62  ;;  %v2422_v62 = vld [vmem:[%s3371_s1 + $0x1a8] ss:$16 sps:$4 sm:$0xff]  }
  0x3c   :  { %1345 = vmatpush2.bf16.msra.mxu1 %v2335_v63  ;;  %1305 = vmatprep.subr.bf16.mxu0 %v2336_v0  ;;  %v2427_v63 = vld [vmem:[%s3371_s1 + $0x544] ss:$16 sps:$4 sm:$0xff]   ;;  %v2430_v0 = vld [vmem:[%s3371_s1 + $0x18c] ss:$16 sps:$4 sm:$0xff]  }
  0x3d   :  { %1346 = vmatprep.subr.bf16.mxu1 %v2338_v1  ;;  %v2425_v1 = vld [vmem:[%s3371_s1 + $0x540] ss:$16 sps:$4 sm:$0xff]  }
  0x3f   :  { %1306 = vmatpush2.bf16.msra.mxu0 %v2340_v2  ;;  %v2428_v2 = vld [vmem:[%s3371_s1 + $0x188] ss:$16 sps:$4 sm:$0xff]  }
  0x40   :  { %1347 = vmatpush2.bf16.msra.mxu1 %v2341_v3  ;;  %1357 = vmatprep.subr.bf16.mxu0 %v2349_v4  ;;  %v2433_v3 = vld [vmem:[%s3371_s1 + $0x524] ss:$16 sps:$4 sm:$0xff]   ;;  %v2436_v4 = vld [vmem:[%s3371_s1 + $0x16c] ss:$16 sps:$4 sm:$0xff]  }
  0x41   :  { %1410 = vmatprep.subr.bf16.mxu1 %v2352_v5  ;;  %v2431_v5 = vld [vmem:[%s3371_s1 + $0x520] ss:$16 sps:$4 sm:$0xff]  }
  0x42   :  { %1308 = vmatmul.mubr.bf16.vlgmr.msra.gmra.mxu0 %v2826_v6 }
  0x43   :  { %1349 = vmatmul.mubr.bf16.vlgmr.msra.gmra.mxu1 %v2828_v7  ;;  %1358 = vmatpush1.bf16.msra.mxu0 %v2347_v8  ;;  %v2434_v8 = vld [vmem:[%s3371_s1 + $0x168] ss:$16 sps:$4 sm:$0xff]  }
  0x44   :  { %1411 = vmatpush1.bf16.msra.mxu1 %v2350_v9  ;;  %1359 = vmatprep.subr.bf16.mxu0 %v2355_v10  ;;  %v2439_v9 = vld [vmem:[%s3371_s1 + $0x504] ss:$16 sps:$4 sm:$0xff]   ;;  %v2442_v10 = vld [vmem:[%s3371_s1 + $0x14c] ss:$16 sps:$4 sm:$0xff]  }
  0x45   :  { %1412 = vmatprep.subr.bf16.mxu1 %v2358_v11  ;;  %1430 = vmatprep.mubr.bf16.mxu1 %v2585_v17  ;;  %v2437_v11 = vld [vmem:[%s3371_s1 + $0x500] ss:$16 sps:$4 sm:$0xff]  }
  0x46   :  { %1389 = vmatprep.mubr.bf16.mxu0 %v2923_v36 }
  0x47   :  { %1360 = vmatpush1.bf16.msra.mxu0 %v2353_v12  ;;  %v2440_v12 = vld [vmem:[%s3371_s1 + $0x148] ss:$16 sps:$4 sm:$0xff]  }
  0x48   :  { %1413 = vmatpush1.bf16.msra.mxu1 %v2356_v13  ;;  %1361 = vmatprep.subr.bf16.mxu0 %v2361_v14  ;;  %v2447_v13 = vld [vmem:[%s3371_s1 + $0x12c] ss:$16 sps:$4 sm:$0xff]  }
  0x49   :  { %1439 = vmatprep.subr.bf16.mxu1 %v2364_v15  ;;  %v2450_v14 = vld [vmem:[%s3371_s1 + $0x2ec] ss:$16 sps:$4 sm:$0xff]   ;;  %v3045_v15 = vcombine.low %v2916_v34, %v2916_v34 }
  0x4a   :  { %v2477_v34 = vld [vmem:[%s3371_s1 + $0x24c] ss:$16 sps:$4 sm:$0xff]  }
  0x4b   :  { %2166 = vmatmul.mubr.msk.bf16.vlgmr.msra.gmra.mxu1 %vm1271_vm0, %v2859_v16  ;;  %1362 = vmatpush1.bf16.msra.mxu0 %v2359_v18  ;;  %v2445_v18 = vld [vmem:[%s3371_s1 + $0x128] ss:$16 sps:$4 sm:$0xff]  }
  0x4c   :  { %1440 = vmatpush1.bf16.msra.mxu1 %v2362_v19  ;;  %1363 = vmatprep.subr.bf16.mxu0 %v2367_v20  ;;  %v2448_v19 = vld [vmem:[%s3371_s1 + $0x2e8] ss:$16 sps:$4 sm:$0xff]   ;;  %v2453_v20 = vld [vmem:[%s3371_s1 + $0x10c] ss:$16 sps:$4 sm:$0xff]  }
  0x4d   :  { %1441 = vmatprep.subr.bf16.mxu1 %v2370_v21  ;;  %1471 = vmatprep.mubr.bf16.mxu1 %v2763_v49  ;;  %v2404_v49 = vld [vmem:[%s3371_s1 + $0x8] ss:$16 sps:$4 sm:$0xff]   ;;  %v2456_v21 = vld [vmem:[%s3371_s1 + $0x2cc] ss:$16 sps:$4 sm:$0xff]  }
  0x4f   :  { %1364 = vmatpush1.bf16.msra.mxu0 %v2365_v22  ;;  %v2451_v22 = vld [vmem:[%s3371_s1 + $0x108] ss:$16 sps:$4 sm:$0xff]  }
  0x50   :  { %1442 = vmatpush1.bf16.msra.mxu1 %v2368_v23  ;;  %1365 = vmatprep.subr.bf16.mxu0 %v2373_v24  ;;  %v2454_v23 = vld [vmem:[%s3371_s1 + $0x2c8] ss:$16 sps:$4 sm:$0xff]   ;;  %v2459_v24 = vld [vmem:[%s3371_s1 + $0x2ac] ss:$16 sps:$4 sm:$0xff]  }
  0x51   :  { %1443 = vmatprep.subr.bf16.mxu1 %v2376_v25  ;;  %v2462_v25 = vld [vmem:[%s3371_s1 + $0x4ec] ss:$16 sps:$4 sm:$0xff]  }
  0x53   :  { %1366 = vmatpush1.bf16.msra.mxu0 %v2371_v26  ;;  %v2457_v26 = vld [vmem:[%s3371_s1 + $0x2a8] ss:$16 sps:$4 sm:$0xff]  }
  0x54   :  { %1444 = vmatpush1.bf16.msra.mxu1 %v2374_v27  ;;  %1367 = vmatprep.subr.bf16.mxu0 %v2379_v28  ;;  %v2460_v27 = vld [vmem:[%s3371_s1 + $0x4e8] ss:$16 sps:$4 sm:$0xff]   ;;  %v2465_v28 = vld [vmem:[%s3371_s1 + $0x28c] ss:$16 sps:$4 sm:$0xff]  }
  0x55   :  { %1445 = vmatprep.subr.bf16.mxu1 %v2382_v29  ;;  %v2463_v29 = vld [vmem:[%s3371_s1 + $0x288] ss:$16 sps:$4 sm:$0xff]  }
  0x57   :  { %1368 = vmatpush1.bf16.msra.mxu0 %v2377_v30  ;;  %v2466_v30 = vld [vmem:[%s3371_s1 + $0x4c8] ss:$16 sps:$4 sm:$0xff]  }
  0x58   :  { %1446 = vmatpush1.bf16.msra.mxu1 %v2380_v31  ;;  %1369 = vmatprep.subr.bf16.mxu0 %v2385_v32  ;;  %v2471_v31 = vld [vmem:[%s3371_s1 + $0x26c] ss:$16 sps:$4 sm:$0xff]   ;;  %v2469_v32 = vld [vmem:[%s3371_s1 + $0x268] ss:$16 sps:$4 sm:$0xff]  }
  0x59   :  { %1447 = vmatprep.subr.bf16.mxu1 %v2388_v33  ;;  %v2472_v33 = vld [vmem:[%s3371_s1 + $0x4a8] ss:$16 sps:$4 sm:$0xff]  }
  0x5b   :  { %1370 = vmatpush1.bf16.msra.mxu0 %v2383_v35  ;;  %v2480_v35 = vld [vmem:[%s3371_s1 + $0x48c] ss:$16 sps:$4 sm:$0xff]  }
  0x5c   :  { %1448 = vmatpush1.bf16.msra.mxu1 %v2386_v37  ;;  %1371 = vmatprep.subr.bf16.mxu0 %v2391_v38  ;;  %v2478_v37 = vld [vmem:[%s3371_s1 + $0x488] ss:$16 sps:$4 sm:$0xff]   ;;  %v2483_v38 = vld [vmem:[%s3371_s1 + $0x22c] ss:$16 sps:$4 sm:$0xff]  }
  0x5d   :  { %1449 = vmatprep.subr.bf16.mxu1 %v2394_v39  ;;  %v2486_v39 = vld [vmem:[%s3371_s1 + $0x46c] ss:$16 sps:$4 sm:$0xff]  }
  0x5f   :  { %1372 = vmatpush1.bf16.msra.mxu0 %v2389_v40  ;;  %v2481_v40 = vld [vmem:[%s3371_s1 + $0x228] ss:$16 sps:$4 sm:$0xff]  }
  0x60   :  { %1450 = vmatpush1.bf16.msra.mxu1 %v2392_v41  ;;  %1373 = vmatprep.subr.bf16.mxu0 %v2397_v42  ;;  %v2484_v41 = vld [vmem:[%s3371_s1 + $0x468] ss:$16 sps:$4 sm:$0xff]   ;;  %v2489_v42 = vld [vmem:[%s3371_s1 + $0x20c] ss:$16 sps:$4 sm:$0xff]  }
  0x61   :  { %1451 = vmatprep.subr.bf16.mxu1 %v2400_v43  ;;  %v2492_v43 = vld [vmem:[%s3371_s1 + $0x44c] ss:$16 sps:$4 sm:$0xff]  }
  0x63   :  { %1374 = vmatpush2.bf16.msra.mxu0 %v2395_v44  ;;  %v2487_v44 = vld [vmem:[%s3371_s1 + $0x208] ss:$16 sps:$4 sm:$0xff]  }
  0x64   :  { %1452 = vmatpush1.bf16.msra.mxu1 %v2398_v45  ;;  %1375 = vmatprep.subr.bf16.mxu0 %v2403_v46  ;;  %v2490_v45 = vld [vmem:[%s3371_s1 + $0x448] ss:$16 sps:$4 sm:$0xff]   ;;  %v2495_v46 = vld [vmem:[%s3371_s1 + $0x3ec] ss:$16 sps:$4 sm:$0xff]  }
  0x65   :  { %1453 = vmatprep.subr.bf16.mxu1 %v2406_v47  ;;  %v2498_v47 = vld [vmem:[%s3371_s1 + $0x42c] ss:$16 sps:$4 sm:$0xff]  }
  0x67   :  { %1376 = vmatpush2.bf16.msra.mxu0 %v2401_v48  ;;  %v2493_v48 = vld [vmem:[%s3371_s1 + $0x3e8] ss:$16 sps:$4 sm:$0xff]  }
  0x68   :  { %1454 = vmatpush1.bf16.msra.mxu1 %v2404_v49  ;;  %1377 = vmatprep.subr.bf16.mxu0 %v2409_v50  ;;  %v2496_v49 = vld [vmem:[%s3371_s1 + $0x428] ss:$16 sps:$4 sm:$0xff]   ;;  %v2501_v50 = vld [vmem:[%s3371_s1 + $0x3cc] ss:$16 sps:$4 sm:$0xff]  }
  0x69   :  { %1455 = vmatprep.subr.bf16.mxu1 %v2412_v51  ;;  %v2504_v51 = vld [vmem:[%s3371_s1 + $0x40c] ss:$16 sps:$4 sm:$0xff]  }
  0x6b   :  { %1378 = vmatpush2.bf16.msra.mxu0 %v2407_v53  ;;  %v2499_v53 = vld [vmem:[%s3371_s1 + $0x3c8] ss:$16 sps:$4 sm:$0xff]  }
  0x6c   :  { %1456 = vmatpush2.bf16.msra.mxu1 %v2410_v54  ;;  %1379 = vmatprep.subr.bf16.mxu0 %v2415_v55  ;;  %v2502_v54 = vld [vmem:[%s3371_s1 + $0x408] ss:$16 sps:$4 sm:$0xff]   ;;  %v2507_v55 = vld [vmem:[%s3371_s1 + $0x3ac] ss:$16 sps:$4 sm:$0xff]  }
  0x6d   :  { %1457 = vmatprep.subr.bf16.mxu1 %v2418_v56  ;;  %v2510_v56 = vld [vmem:[%s3371_s1 + $0x5ec] ss:$16 sps:$4 sm:$0xff]  }
  0x6f   :  { %1380 = vmatpush2.bf16.msra.mxu0 %v2413_v57  ;;  %v2505_v57 = vld [vmem:[%s3371_s1 + $0x3a8] ss:$16 sps:$4 sm:$0xff]  }
  0x70   :  { %1458 = vmatpush2.bf16.msra.mxu1 %v2416_v58  ;;  %1381 = vmatprep.subr.bf16.mxu0 %v2421_v59  ;;  %v2508_v58 = vld [vmem:[%s3371_s1 + $0x5e8] ss:$16 sps:$4 sm:$0xff]   ;;  %v2513_v59 = vld [vmem:[%s3371_s1 + $0x38c] ss:$16 sps:$4 sm:$0xff]  }
  0x71   :  { %1459 = vmatprep.subr.bf16.mxu1 %v2424_v60  ;;  %v2516_v60 = vld [vmem:[%s3371_s1 + $0x5cc] ss:$16 sps:$4 sm:$0xff]  }
  0x73   :  { %1382 = vmatpush2.bf16.msra.mxu0 %v2419_v61  ;;  %v2511_v61 = vld [vmem:[%s3371_s1 + $0x388] ss:$16 sps:$4 sm:$0xff]  }
  0x74   :  { %1460 = vmatpush2.bf16.msra.mxu1 %v2422_v62  ;;  %1383 = vmatprep.subr.bf16.mxu0 %v2427_v63  ;;  %v2514_v62 = vld [vmem:[%s3371_s1 + $0x5c8] ss:$16 sps:$4 sm:$0xff]   ;;  %v2519_v63 = vld [vmem:[%s3371_s1 + $0x36c] ss:$16 sps:$4 sm:$0xff]  }
  0x75   :  { %1461 = vmatprep.subr.bf16.mxu1 %v2430_v0  ;;  %v2522_v0 = vld [vmem:[%s3371_s1 + $0x5ac] ss:$16 sps:$4 sm:$0xff]  }
  0x77   :  { %1384 = vmatpush2.bf16.msra.mxu0 %v2425_v1  ;;  %v2517_v1 = vld [vmem:[%s3371_s1 + $0x368] ss:$16 sps:$4 sm:$0xff]  }
  0x78   :  { %1462 = vmatpush2.bf16.msra.mxu1 %v2428_v2  ;;  %1385 = vmatprep.subr.bf16.mxu0 %v2433_v3  ;;  %v2520_v2 = vld [vmem:[%s3371_s1 + $0x5a8] ss:$16 sps:$4 sm:$0xff]   ;;  %v2525_v3 = vld [vmem:[%s3371_s1 + $0x34c] ss:$16 sps:$4 sm:$0xff]  }
  0x79   :  { %1463 = vmatprep.subr.bf16.mxu1 %v2436_v4  ;;  %v2528_v4 = vld [vmem:[%s3371_s1 + $0x58c] ss:$16 sps:$4 sm:$0xff]  }
  0x7b   :  { %1386 = vmatpush2.bf16.msra.mxu0 %v2431_v5  ;;  %v2523_v5 = vld [vmem:[%s3371_s1 + $0x348] ss:$16 sps:$4 sm:$0xff]  }
  0x7c   :  { %1464 = vmatpush2.bf16.msra.mxu1 %v2434_v8  ;;  %1387 = vmatprep.subr.bf16.mxu0 %v2439_v9  ;;  %v2526_v8 = vld [vmem:[%s3371_s1 + $0x588] ss:$16 sps:$4 sm:$0xff]   ;;  %v2531_v9 = vld [vmem:[%s3371_s1 + $0x32c] ss:$16 sps:$4 sm:$0xff]  }
  0x7d   :  { %1465 = vmatprep.subr.bf16.mxu1 %v2442_v10  ;;  %v2534_v10 = vld [vmem:[%s3371_s1 + $0x56c] ss:$16 sps:$4 sm:$0xff]  }
  0x7f   :  { %1388 = vmatpush2.bf16.msra.mxu0 %v2437_v11  ;;  %v2529_v11 = vld [vmem:[%s3371_s1 + $0x328] ss:$16 sps:$4 sm:$0xff]  }
  0x80   :  { %1466 = vmatpush2.bf16.msra.mxu1 %v2440_v12  ;;  %1480 = vmatprep.subr.bf16.mxu0 %v2450_v14  ;;  %v2532_v12 = vld [vmem:[%s3371_s1 + $0x568] ss:$16 sps:$4 sm:$0xff]   ;;  %v2540_v14 = vld [vmem:[%s3371_s1 + $0x54c] ss:$16 sps:$4 sm:$0xff]  }
  0x81   :  { %1467 = vmatprep.subr.bf16.mxu1 %v2447_v13  ;;  %v2537_v13 = vld [vmem:[%s3371_s1 + $0x30c] ss:$16 sps:$4 sm:$0xff]  }
  0x82   :  { %1390 = vmatmul.mubr.bf16.vlgmr.msra.gmra.mxu0 %v3045_v15 }
  0x83   :  { %1481 = vmatpush1.bf16.msra.mxu0 %v2448_v19  ;;  %1512 = vmatprep.mubr.bf16.mxu0 %v2771_v52  ;;  %v2468_v52 = vld [vmem:[%s3371_s1 + $0x4cc] ss:$16 sps:$4 sm:$0xff]   ;;  %v2538_v19 = vld [vmem:[%s3371_s1 + $0x548] ss:$16 sps:$4 sm:$0xff]  }
  0x84   :  { %1468 = vmatpush2.bf16.msra.mxu1 %v2445_v18  ;;  %1482 = vmatprep.subr.bf16.mxu0 %v2456_v21  ;;  %v2535_v18 = vld [vmem:[%s3371_s1 + $0x308] ss:$16 sps:$4 sm:$0xff]   ;;  %v2546_v21 = vld [vmem:[%s3371_s1 + $0x62c] ss:$16 sps:$4 sm:$0xff]  }
  0x85   :  { %1469 = vmatprep.subr.bf16.mxu1 %v2453_v20  ;;  %v2543_v20 = vld [vmem:[%s3371_s1 + $0x52c] ss:$16 sps:$4 sm:$0xff]  }
  0x87   :  { %1483 = vmatpush1.bf16.msra.mxu0 %v2454_v23  ;;  %v2544_v23 = vld [vmem:[%s3371_s1 + $0x628] ss:$16 sps:$4 sm:$0xff]  }
  0x88   :  { %1470 = vmatpush2.bf16.msra.mxu1 %v2451_v22  ;;  %1484 = vmatprep.subr.bf16.mxu0 %v2459_v24  ;;  %v2541_v22 = vld [vmem:[%s3371_s1 + $0x528] ss:$16 sps:$4 sm:$0xff]   ;;  %v2549_v24 = vld [vmem:[%s3371_s1 + $0x50c] ss:$16 sps:$4 sm:$0xff]  }
  0x89   :  { %1521 = vmatprep.subr.bf16.mxu1 %v2462_v25  ;;  %v2552_v25 = vld [vmem:[%s3371_s1 + $0x60c] ss:$16 sps:$4 sm:$0xff]  }
  0x8b   :  { %1472 = vmatmul.mubr.bf16.vlgmr.msra.gmra.mxu1 %v2826_v6  ;;  %1485 = vmatpush1.bf16.msra.mxu0 %v2457_v26  ;;  %v2474_v6 = vld [vmem:[%s3371_s1 + $0x4ac] ss:$16 sps:$4 sm:$0xff]   ;;  %v2547_v26 = vld [vmem:[%s3371_s1 + $0x508] ss:$16 sps:$4 sm:$0xff]  }
  0x8c   :  { %1522 = vmatpush1.bf16.msra.mxu1 %v2460_v27  ;;  %1486 = vmatprep.subr.bf16.mxu0 %v2465_v28  ;;  %v2550_v27 = vld [vmem:[%s3371_s1 + $0x608] ss:$16 sps:$4 sm:$0xff]  }
  0x8d   :  { %1523 = vmatprep.subr.bf16.mxu1 %v2468_v52  ;;  %1553 = vmatprep.mubr.bf16.mxu1 %v2923_v36  ;;  %v2475_v36 = vld [vmem:[%s3371_s1 + $0x248] ss:$16 sps:$4 sm:$0xff]   ;;  %v2555_v52 = vld [vmem:[%s3373_s3 + $0x70] sm:$0xff]  }
  0x8e   :  { %v2553_v28 = vld [vmem:[%s3373_s3 + $0x78] sm:$0xff]  }
  0x8f   :  { %1487 = vmatpush1.bf16.msra.mxu0 %v2463_v29  ;;  %v2557_v29 = vld [vmem:[%s3373_s3 + $0x68] sm:$0xff]  }
  0x90   :  { %1524 = vmatpush1.bf16.msra.mxu1 %v2466_v30  ;;  %1488 = vmatprep.subr.bf16.mxu0 %v2471_v31  ;;  %v2558_v30 = vld [vmem:[%s3373_s3 + $0x28] sm:$0xff]   ;;  %v2570_v31 = vld [vmem:[%s3373_s3 + $0xb8] sm:$0xff]  }
  0x91   :  { %1525 = vmatprep.subr.bf16.mxu1 %v2474_v6  ;;  %v2571_v6 = vld [vmem:[%s3373_s3 + $0xf0] sm:$0xff]  }
  0x93   :  { %1489 = vmatpush1.bf16.msra.mxu0 %v2469_v32  ;;  %v2560_v32 = vld [vmem:[%s3373_s3 + $0x20] sm:$0xff]  }
  0x94   :  { %1526 = vmatpush1.bf16.msra.mxu1 %v2472_v33  ;;  %1490 = vmatprep.subr.bf16.mxu0 %v2477_v34  ;;  %v2572_v33 = vld [vmem:[%s3373_s3 + $0xb0] sm:$0xff]   ;;  %v2561_v34 = vld [vmem:[%s3373_s3 + $0x58] sm:$0xff]  }
  0x95   :  { %1527 = vmatprep.subr.bf16.mxu1 %v2480_v35  ;;  %v2573_v35 = vld [vmem:[%s3373_s3 + $0xe8] sm:$0xff]  }
  0x97   :  { %1491 = vmatpush1.bf16.msra.mxu0 %v2475_v36  ;;  %v2562_v36 = vld [vmem:[%s3373_s3 + $0x18] sm:$0xff]  }
  0x98   :  { %1528 = vmatpush1.bf16.msra.mxu1 %v2478_v37  ;;  %1492 = vmatprep.subr.bf16.mxu0 %v2483_v38  ;;  %v2574_v37 = vld [vmem:[%s3373_s3 + $0xa8] sm:$0xff]   ;;  %v2563_v38 = vld [vmem:[%s3373_s3 + $0x50] sm:$0xff]  }
  0x99   :  { %1529 = vmatprep.subr.bf16.mxu1 %v2486_v39  ;;  %v2564_v39 = vld [vmem:[%s3373_s3 + $0x10] sm:$0xff]  }
  0x9b   :  { %1493 = vmatpush1.bf16.msra.mxu0 %v2481_v40  ;;  %v2565_v40 = vld [vmem:[%s3373_s3 + $0x48] sm:$0xff]  }
  0x9c   :  { %1530 = vmatpush1.bf16.msra.mxu1 %v2484_v41  ;;  %1494 = vmatprep.subr.bf16.mxu0 %v2489_v42  ;;  %v2566_v41 = vld [vmem:[%s3373_s3 + $0x8] sm:$0xff]   ;;  %v2567_v42 = vld [vmem:[%s3373_s3 + $0x40] sm:$0xff]  }
  0x9d   :  { %1531 = vmatprep.subr.bf16.mxu1 %v2492_v43  ;;  %v2568_v43 = vld [vmem:[%s3373_s3] sm:$0xff]  }
  0x9f   :  { %1495 = vmatpush1.bf16.msra.mxu0 %v2487_v44  ;;  %v2575_v44 = vld [vmem:[%s3373_s3 + $0xe0] sm:$0xff]  }
  0xa0   :  { %1532 = vmatpush1.bf16.msra.mxu1 %v2490_v45  ;;  %1496 = vmatprep.subr.bf16.mxu0 %v2495_v46  ;;  %v2576_v45 = vld [vmem:[%s3373_s3 + $0xa0] sm:$0xff]  }
  0xa1   :  { %1533 = vmatprep.subr.bf16.mxu1 %v2498_v47 }
  0xa3   :  { %1497 = vmatpush2.bf16.msra.mxu0 %v2493_v48 }
  0xa4   :  { %1534 = vmatpush1.bf16.msra.mxu1 %v2496_v49  ;;  %1498 = vmatprep.subr.bf16.mxu0 %v2501_v50  ;;  %v2577_v50 = vld [vmem:[%s3373_s3 + $0xd8] sm:$0xff]  }
  0xa5   :  { %1535 = vmatprep.subr.bf16.mxu1 %v2504_v51  ;;  %v2578_v51 = vld [vmem:[%s3373_s3 + $0x98] sm:$0xff]  }
  0xa7   :  { %1499 = vmatpush2.bf16.msra.mxu0 %v2499_v53 }
  0xa8   :  { %1536 = vmatpush1.bf16.msra.mxu1 %v2502_v54  ;;  %1500 = vmatprep.subr.bf16.mxu0 %v2507_v55 }
  0xa9   :  { %1537 = vmatprep.subr.bf16.mxu1 %v2510_v56 }
  0xab   :  { %1501 = vmatpush2.bf16.msra.mxu0 %v2505_v57  ;;  %v2579_v57 = vld [vmem:[%s3373_s3 + $0xd0] sm:$0xff]  }
  0xac   :  { %1538 = vmatpush2.bf16.msra.mxu1 %v2508_v58  ;;  %1502 = vmatprep.subr.bf16.mxu0 %v2513_v59  ;;  %v2580_v58 = vld [vmem:[%s3373_s3 + $0x90] sm:$0xff]  }
  0xad   :  { %1539 = vmatprep.subr.bf16.mxu1 %v2516_v60 }
  0xaf   :  { %1503 = vmatpush2.bf16.msra.mxu0 %v2511_v61  ;;  %v2581_v61 = vld [vmem:[%s3373_s3 + $0xc8] sm:$0xff]  }
  0xb0   :  { %1540 = vmatpush2.bf16.msra.mxu1 %v2514_v62  ;;  %1504 = vmatprep.subr.bf16.mxu0 %v2519_v63  ;;  %v2582_v62 = vld [vmem:[%s3373_s3 + $0x88] sm:$0xff]  }
  0xb1   :  { %1541 = vmatprep.subr.bf16.mxu1 %v2522_v0 }
  0xb3   :  { %1505 = vmatpush2.bf16.msra.mxu0 %v2517_v1  ;;  %v2583_v1 = vld [vmem:[%s3373_s3 + $0xc0] sm:$0xff]  }
  0xb4   :  { %1542 = vmatpush2.bf16.msra.mxu1 %v2520_v2  ;;  %1506 = vmatprep.subr.bf16.mxu0 %v2525_v3  ;;  %v2584_v2 = vld [vmem:[%s3373_s3 + $0x80] sm:$0xff]   ;;  %v227_v3 = vlaneseq }
  0xb5   :  { %1543 = vmatprep.subr.bf16.mxu1 %v2528_v4 }
  0xb6   :  { %v228_v4 = vshrl.u32 %v227_v3, 7 }
  0xb7   :  { %1507 = vmatpush2.bf16.msra.mxu0 %v2523_v5 }
  0xb8   :  { %1544 = vmatpush2.bf16.msra.mxu1 %v2526_v8  ;;  %1508 = vmatprep.subr.bf16.mxu0 %v2531_v9  ;;  %v229_v5 = vsub.s32 0, %v228_v4  ;;  %v225_v8 = vld [vmem:[%s3374_s2] sm:$0xf]  ;;  %v233_v9 = vsub.s32 1, %v228_v4 }
  0xb9   :  { %1545 = vmatprep.subr.bf16.mxu1 %v2534_v10 }
  0xba   :  { %v230_v10 = vrot.slane %v225_v8, %v229_v5 }
  0xbb   :  { %1509 = vmatpush2.bf16.msra.mxu0 %v2529_v11  ;;  %v234_v11 = vrot.slane %v225_v8, %v233_v9 }
  0xbc   :  { %1546 = vmatpush2.bf16.msra.mxu1 %v2532_v12  ;;  %1510 = vmatprep.subr.bf16.mxu0 %v2537_v13 }
  0xbd   :  { %1547 = vmatprep.subr.bf16.mxu1 %v2540_v14 }
  0xbf   :  { %1511 = vmatpush2.bf16.msra.mxu0 %v2535_v18 }
  0xc0   :  { %1548 = vmatpush2.bf16.msra.mxu1 %v2538_v19  ;;  %1574 = vmatprep.subr.bf16.mxu0 %v2546_v21 }
  0xc1   :  { %1549 = vmatprep.subr.bf16.mxu1 %v2543_v20 }
  0xc2   :  { %1513 = vmatmul.mubr.bf16.vlgmr.msra.gmra.mxu0 %v2828_v7  ;;  %v2554_v7 = vld [vmem:[%s3373_s3 + $0x38] sm:$0xff]  }
  0xc3   :  { %1575 = vmatpush1.bf16.msra.mxu0 %v2544_v23  ;;  %1594 = vmatprep.mubr.bf16.mxu0 %v2585_v17  ;;  %v2556_v17 = vld [vmem:[%s3373_s3 + $0x30] sm:$0xff]  }
  0xc4   :  { %1550 = vmatpush2.bf16.msra.mxu1 %v2541_v22  ;;  %1576 = vmatprep.subr.bf16.mxu0 %v2552_v25 }
  0xc5   :  { %1551 = vmatprep.subr.bf16.mxu1 %v2549_v24 }
  0xc7   :  { %1577 = vmatpush1.bf16.msra.mxu0 %v2550_v27 }
  0xc8   :  { %1552 = vmatpush2.bf16.msra.mxu1 %v2547_v26  ;;  %2201 = vmatprep.subr.bf16.mxu0 %v2553_v28 }
  0xca   :  { %2167 = vmatmul.mubr.msk.bf16.vlgmr.msra.gmra.mxu0 %vm1271_vm0, %v2859_v16  ;;  %v2569_v16 = vld [vmem:[%s3373_s3 + $0xf8] sm:$0xff]  }
  0xcb   :  { %1554 = vmatmul.mubr.bf16.vlgmr.msra.gmra.mxu1 %v3045_v15  ;;  %2202 = vmatpush3.bf16.msra.mxu0 %v2554_v7  ;;  %v2559_v15 = vld [vmem:[%s3373_s3 + $0x60] sm:$0xff]  }
  0xcc   :  { %2203 = vmatprep.subr.bf16.mxu0 %v2555_v52  ;;  %2223 = vmatprep.subr.bf16.mxu1 %v2569_v16  ;;  %v237_v16 = vsub.s32 2, %v228_v4 }
  0xcd   :  { %2224 = vmatpush3.bf16.msra.mxu1 %v2570_v31  ;;  %v241_v31 = vsub.s32 3, %v228_v4 }
  0xce   :  { %2225 = vmatprep.subr.bf16.mxu1 %v2571_v6 }
  0xcf   :  { %2204 = vmatpush3.bf16.msra.mxu0 %v2556_v17 }
  0xd0   :  { %2205 = vmatprep.subr.bf16.mxu0 %v2557_v29 }
  0xd1   :  { %2226 = vmatpush3.bf16.msra.mxu1 %v2572_v33 }
  0xd2   :  { %2227 = vmatprep.subr.bf16.mxu1 %v2573_v35 }
  0xd3   :  { %2206 = vmatpush3.bf16.msra.mxu0 %v2558_v30 }
  0xd4   :  { %2207 = vmatprep.subr.bf16.mxu0 %v2559_v15 }
  0xd5   :  { %2228 = vmatpush3.bf16.msra.mxu1 %v2574_v37 }
  0xd6   :  { %2229 = vmatprep.subr.bf16.mxu1 %v2575_v44 }
  0xd7   :  { %2208 = vmatpush3.bf16.msra.mxu0 %v2560_v32  ;;  %v238_v32 = vrot.slane %v225_v8, %v237_v16 }
  0xd8   :  { %2209 = vmatprep.subr.bf16.mxu0 %v2561_v34  ;;  %v242_v34 = vrot.slane %v225_v8, %v241_v31 }
  0xd9   :  { %2230 = vmatpush3.bf16.msra.mxu1 %v2576_v45 }
  0xda   :  { %2231 = vmatprep.subr.bf16.mxu1 %v2577_v50 }
  0xdb   :  { %2210 = vmatpush3.bf16.msra.mxu0 %v2562_v36 }
  0xdc   :  { %2211 = vmatprep.subr.bf16.mxu0 %v2563_v38 }
  0xdd   :  { %2232 = vmatpush3.bf16.msra.mxu1 %v2578_v51 }
  0xde   :  { %2233 = vmatprep.subr.bf16.mxu1 %v2579_v57 }
  0xdf   :  { %2212 = vmatpush3.bf16.msra.mxu0 %v2564_v39 }
  0xe0   :  { %2213 = vmatprep.subr.bf16.mxu0 %v2565_v40 }
  0xe1   :  { %2234 = vmatpush3.bf16.msra.mxu1 %v2580_v58 }
  0xe2   :  { %2235 = vmatprep.subr.bf16.mxu1 %v2581_v61 }
  0xe3   :  { %2214 = vmatpush3.bf16.msra.mxu0 %v2566_v41 }
  0xe4   :  { %2215 = vmatprep.subr.bf16.mxu0 %v2567_v42 }
  0xe5   :  { %2236 = vmatpush3.bf16.msra.mxu1 %v2582_v62 }
  0xe6   :  { %2237 = vmatprep.subr.bf16.mxu1 %v2583_v1 }
  0xe7   :  { %2216 = vmatpush3.bf16.msra.mxu0 %v2568_v43 }
  0xe9   :  { %2238 = vmatpush3.bf16.msra.mxu1 %v2584_v2 }
 0x102   :  { %v1309_v46 = vpop.f32.mrf.mxu0 }
 0x103   :  { %v1350_v47 = vpop.f32.mrf.mxu1  ;;  %v1310_v12 = vadd.f32 %v1309_v46, %v230_v10 }
 0x104   :  { %v1311_v48 = vpop.f32.mrf.mxu0 }
 0x105   :  { %v1352_v49 = vpop.f32.mrf.mxu1  ;;  %v1312_v13 = vadd.f32 %v1311_v48, %v234_v11  ;;  %v1351_v14 = vadd.f32 %v1350_v47, %v1310_v12 }
 0x106   :  { %v1313_v53 = vpop.f32.mrf.mxu0 }
 0x107   :  { %v1354_v54 = vpop.f32.mrf.mxu1  ;;  %v1353_v19 = vadd.f32 %v1352_v49, %v1312_v13 }
 0x108   :  { %v1314_v55 = vpop.f32.mrf.mxu0 }
 0x109   :  { %v1355_v56 = vpop.f32.mrf.mxu1 }
 0x10b   :  { %v1432_v59 = vpop.f32.mrf.mxu1 }
 0x10d   :  { %v1434_v60 = vpop.f32.mrf.mxu1 }
 0x10f   :  { %v1436_v63 = vpop.f32.mrf.mxu1 }
 0x110   :  { %v2168_v63 = vld [vmem:[%s3375_s4] ss:$0 sm:$0xff] }
 0x111   :  { %v1437_v0 = vpop.f32.mrf.mxu1 }
 0x142   :  { %v1391_v18 = vpop.f32.mrf.mxu0 }
 0x143   :  { %v1392_v20 = vadd.f32 %v1391_v18, %v1351_v14 }
 0x144   :  { %v1393_v21 = vpop.f32.mrf.mxu0 }
 0x145   :  { %v1433_v22 = vadd.f32 %v1432_v59, %v1392_v20  ;;  %v1394_v23 = vadd.f32 %v1393_v21, %v1353_v19 }
 0x146   :  { %v1395_v24 = vpop.f32.mrf.mxu0 }
 0x147   :  { %v1435_v25 = vadd.f32 %v1434_v60, %v1394_v23  ;;  %v1603_v26 = vmax.f32 %v1433_v22, 0.0 }
 0x148   :  { %v1396_v27 = vpop.f32.mrf.mxu0 }
 0x149   :  { %v1604_v28 = vmax.f32 %v1435_v25, 0.0  ;;  %v1607_v17 = vpack.c.bf16 %v1603_v26, %v1603_v26 }
 0x14b   :  { %v1473_v7 = vpop.f32.mrf.mxu1  ;;  %v1608_v52 = vpack.c.bf16 %v1604_v28, %v1604_v28 }
 0x14c   :  { %v1474_v36 = vadd.f32 %v1473_v7, %v238_v32 }
 0x14d   :  { %v1475_v29 = vpop.f32.mrf.mxu1  ;;  %1906 = vmatprep.mubr.bf16.mxu0 %v1608_v52 }
 0x14e   :  { %1907 = vmatmul.mubr.bf16.vlgmr.msra.gmra.mxu0 %v1607_v17  ;;  %v1476_v38 = vadd.f32 %v1475_v29, %v242_v34 }
 0x14f   :  { %v1477_v30 = vpop.f32.mrf.mxu1 }
 0x151   :  { %v1478_v15 = vpop.f32.mrf.mxu1 }
 0x182   :  { %v1514_v6 = vpop.f32.mrf.mxu0 }
 0x183   :  { %v1515_v39 = vadd.f32 %v1514_v6, %v1474_v36 }
 0x184   :  { %v1516_v33 = vpop.f32.mrf.mxu0 }
 0x185   :  { %v1517_v42 = vadd.f32 %v1516_v33, %v1476_v38 }
 0x186   :  { %v1518_v35 = vpop.f32.mrf.mxu0 }
 0x188   :  { %v1519_v37 = vpop.f32.mrf.mxu0 }
 0x18a   :  { %v1596_v41 = vpop.f32.mrf.mxu0 }
 0x18b   :  { %v1555_v40 = vpop.f32.mrf.mxu1 }
 0x18c   :  { %v1556_v43 = vadd.f32 %v1555_v40, %v1515_v39  ;;  %v1598_v45 = vpop.f32.mrf.mxu0 }
 0x18d   :  { %v1557_v44 = vpop.f32.mrf.mxu1 }
 0x18e   :  { %v1597_v46 = vadd.f32 %v1596_v41, %v1556_v43  ;;  %v1558_v47 = vadd.f32 %v1557_v44, %v1517_v42  ;;  %v1600_v49 = vpop.f32.mrf.mxu0 }
 0x18f   :  { %v1559_v48 = vpop.f32.mrf.mxu1 }
 0x190   :  { %v1599_v50 = vadd.f32 %v1598_v45, %v1558_v47  ;;  %v1605_v51 = vmax.f32 %v1597_v46, 0.0  ;;  %v1601_v54 = vpop.f32.mrf.mxu0 }
 0x191   :  { %v1560_v53 = vpop.f32.mrf.mxu1 }
 0x192   :  { %v1606_v55 = vmax.f32 %v1599_v50, 0.0  ;;  %v1609_v57 = vpack.c.bf16 %v1605_v51, %v1605_v51 }
 0x194   :  { %v1610_v56 = vpack.c.bf16 %v1606_v55, %v1606_v55 }
 0x196   :  { %1946 = vmatprep.mubr.bf16.mxu1 %v1610_v56 }
 0x197   :  { %1947 = vmatmul.mubr.bf16.vlgmr.msra.gmra.mxu1 %v1609_v57 }
 0x20e   :  { %v2217_v58 = vpop.f32.mrf.mxu0 }
 0x210   :  { %v2218_v59 = vpop.f32.mrf.mxu0 }
 0x211   :  { %v2219_v60 = vadd.f32 %v2218_v59, %v2217_v58 }
 0x212   :  { %v2220_v61 = vpop.f32.mrf.mxu0 }
 0x213   :  { %v1909_v2 = vadd.f32 %v2219_v60, %v2168_v63 }
 0x214   :  { %v2221_v62 = vpop.f32.mrf.mxu0 }
 0x257   :  { %v2239_v0 = vpop.f32.mrf.mxu1 }
 0x259   :  { %v2240_v1 = vpop.f32.mrf.mxu1 }
 0x25a   :  { %v2241_v3 = vadd.f32 %v2240_v1, %v2239_v0 }
 0x25b   :  { %v2242_v4 = vpop.f32.mrf.mxu1 }
 0x25c   :  { %v1949_v5 = vadd.f32 %v2241_v3, %v1909_v2 }
 0x25d   :  { %v2243_v8 = vpop.f32.mrf.mxu1 }
 0x25e   :  { %1954 = vst [vmem:[%s3376_s5] sm:$0xff] %v1949_v5 }

</bundles_post_ra>
